<compile_context>
chip_gen: v7x
topology: tpu7x:2x2x1
jax: 0.10.0
libtpu: 0.0.40
codegen_flags: <defaults>
</compile_context>

<pallas_src>
import jax
import jax.numpy as jnp
from jax.experimental import pallas as pl
from jax.experimental.pallas import tpu as pltpu


# ----------------------------- math helpers --------------------------------

def _bn_train(x, w, b, eps=1e-5):
    """BatchNorm1d (training mode): batch stats over axis 0, biased variance.
    Single-pass form with non-negative clamp on the variance."""
    mu = jnp.mean(x, axis=0, keepdims=True)
    ex2 = jnp.mean(x * x, axis=0, keepdims=True)
    var = jnp.maximum(ex2 - mu * mu, 0.0)
    return (x - mu) * jax.lax.rsqrt(var + eps) * w + b


def _softplus(x):
    """Numerically stable softplus (matches F.softplus)."""
    return jnp.maximum(x, 0.0) + jnp.log1p(jnp.exp(-jnp.abs(x)))


# ------------------------------ fused kernel --------------------------------

def _make_kernel(x_flat_dim, fp_pad, feat):
    """Builds the fused kernel with static slab offsets baked in."""
    YP = 128                 # y zero-padded to one lane tile
    OH = 128                 # one-hot(t) zero-padded to one lane tile
    F2 = 2 * feat            # both sub-models fused along lanes

    # input-slab lane offsets
    o_x, o_y = 0, x_flat_dim
    o_fp = o_y + YP
    o_oh = o_fp + fp_pad

    # weight-slab sublane (K) offsets
    k_enc = 0
    k_y = x_flat_dim
    k_fp = k_y + YP
    k_w2 = k_fp + fp_pad
    k_w3 = k_w2 + F2
    k_w4 = k_w3 + F2

    def kernel(inp_ref, wts_ref, gam_ref, vec_ref, o_ref):
        # unpack inputs (static, lane-aligned slices -> no data movement)
        x_flat = inp_ref[:, o_x:o_x + x_flat_dim]
        y_in = inp_ref[:, o_y:o_y + YP]
        fp_in = inp_ref[:, o_fp:o_fp + fp_pad]
        onehot = inp_ref[:, o_oh:o_oh + OH]

        vec = vec_ref[...]                       # [16, 2*feat] biases + BN affine

        # all six timestep-embedding lookups: ONE matmul against the packed table
        # TODO(synk): out-of-range t yields zero gammas instead of erroring like
        # nn.Embedding.
        g = jnp.dot(onehot, gam_ref[...], preferred_element_type=jnp.float32)
        g1 = g[:, 0:F2]
        g2 = g[:, F2:2 * F2]
        g3 = g[:, 2 * F2:3 * F2]

        # encoder (GAP folded into the weights) + self.norm
        # TODO(synk): resnet_s.resnet34 source was not provided; stand-in encoder =
        # global-average-pool over spatial dims + linear projection to feature_dim.
        xe = jnp.dot(x_flat, wts_ref[k_enc:k_enc + x_flat_dim, :],
                     preferred_element_type=jnp.float32) + vec[0:1, :]
        xe = _bn_train(xe, vec[5:6, :], vec[9:10, :])

        # lin1 on cat([y, fp_x]) (split weights), gamma gate, BN, softplus, x gate
        h = (jnp.dot(y_in, wts_ref[k_y:k_y + YP, :],
                     preferred_element_type=jnp.float32)
             + jnp.dot(fp_in, wts_ref[k_fp:k_fp + fp_pad, :],
                       preferred_element_type=jnp.float32)
             + vec[1:2, :])
        h = g1 * h
        h = _softplus(_bn_train(h, vec[6:7, :], vec[10:11, :]))
        h = xe * h

        # lin2 (block-diagonal over the two sub-models) + BN + softplus
        h = g2 * (jnp.dot(h, wts_ref[k_w2:k_w2 + F2, :],
                          preferred_element_type=jnp.float32) + vec[2:3, :])
        h = _softplus(_bn_train(h, vec[7:8, :], vec[11:12, :]))

        # lin3 + BN + softplus
        h = g3 * (jnp.dot(h, wts_ref[k_w3:k_w3 + F2, :],
                          preferred_element_type=jnp.float32) + vec[3:4, :])
        h = _softplus(_bn_train(h, vec[8:9, :], vec[12:13, :]))

        # lin4 (zero-padded to 128 output lanes per model -> dense 256-lane store)
        o_ref[...] = jnp.dot(h, wts_ref[k_w4:k_w4 + F2, :],
                             preferred_element_type=jnp.float32) + vec[4:5, :]

    return kernel


# ---------------------------- parameter packing ------------------------------

def pack_params(p0, p1, *, hw, feat, n_embed):
    """Pack per-model parameters into 3 dense slabs (done once)."""
    F2 = 2 * feat

    def cat2(a, b):
        return jnp.concatenate([a, b], axis=-1)

    def pad_rows(w, rows):
        return jnp.zeros((rows, w.shape[1]), jnp.float32).at[:w.shape[0]].set(w)

    def pad_cols(w, cols):
        return jnp.zeros((w.shape[0], cols), jnp.float32).at[:, :w.shape[1]].set(w)

    def block_diag(a, b):
        top = jnp.concatenate([a, jnp.zeros_like(b)], axis=1)
        bot = jnp.concatenate([jnp.zeros_like(a), b], axis=1)
        return jnp.concatenate([top, bot], axis=0)

    # encoder weights with GAP folded in: [C*HW, 2*feat]
    w_enc_eff = cat2(jnp.repeat(p0["w_enc"] / hw, hw, axis=0),
                     jnp.repeat(p1["w_enc"] / hw, hw, axis=0))
    w1y = cat2(pad_rows(p0["w1_y"], 128), pad_rows(p1["w1_y"], 128))    # [128, 2F]
    w1f = cat2(p0["w1_fp"], p1["w1_fp"])                                # [128, 2F]
    w2 = block_diag(p0["w2"], p1["w2"])                                 # [2F, 2F]
    w3 = block_diag(p0["w3"], p1["w3"])                                 # [2F, 2F]
    w4 = block_diag(pad_cols(p0["w4"], feat), pad_cols(p1["w4"], feat))  # [2F, 2F]
    wts = jnp.concatenate([w_enc_eff, w1y, w1f, w2, w3, w4], axis=0)

    # gamma table: one-hot(t) @ gam gives [g1_m0|g1_m1|g2_m0|g2_m1|g3_m0|g3_m1]
    tbl = jnp.concatenate([cat2(p0["emb1"], p1["emb1"]),
                           cat2(p0["emb2"], p1["emb2"]),
                           cat2(p0["emb3"], p1["emb3"])], axis=1)        # [n_embed, 3*2F]
    gam = jnp.zeros((128, 3 * F2), jnp.float32).at[:n_embed].set(tbl)

    # vector slab: 5 bias rows + 4 BN-weight rows + 4 BN-bias rows, padded to 16
    rows = jnp.concatenate([
        cat2(p0["b_enc"], p1["b_enc"]),
        cat2(p0["b1"], p1["b1"]),
        cat2(p0["b2"], p1["b2"]),
        cat2(p0["b3"], p1["b3"]),
        cat2(pad_cols(p0["b4"], feat), pad_cols(p1["b4"], feat)),
        cat2(p0["bn_w"], p1["bn_w"]),
        cat2(p0["bn_b"], p1["bn_b"]),
    ], axis=0)                                                           # [13, 2F]
    vec = jnp.zeros((16, F2), jnp.float32).at[:13].set(rows)

    return dict(wts=wts, gam=gam, vec=vec)


# ------------------------------ JAX wrapper ---------------------------------

_VMEM = pl.BlockSpec(memory_space=pltpu.MemorySpace.VMEM)


def directional_forward(x, y, t, fp_x, packed, *, y_dim, feat):
    """DirectionalConditionalModel.forward (num_models=2, pred_res_noise).
    One fused, grid-less Pallas kernel computes both sub-models; the wrapper only
    flattens x, pads y, builds the lane-padded one-hot(t) and concatenates the
    four per-call inputs into a single slab (one DMA)."""
    B, C, H, W = x.shape
    x_flat_dim = C * H * W
    fp_pad = fp_x.shape[1]                        # 128 (already lane-aligned)

    x_flat = x.reshape(B, x_flat_dim)
    y_pad = jnp.zeros((B, 128), jnp.float32).at[:, :y.shape[1]].set(y)
    onehot = jax.nn.one_hot(t.astype(jnp.int32), 128, dtype=jnp.float32)
    inp = jnp.concatenate([x_flat, y_pad, fp_x, onehot], axis=1)

    kernel = _make_kernel(x_flat_dim, fp_pad, feat)

    out = pl.pallas_call(
        kernel,
        out_shape=jax.ShapeDtypeStruct((B, 2 * feat), jnp.float32),
        in_specs=[_VMEM, _VMEM, _VMEM, _VMEM],
        out_specs=_VMEM,
    )(inp, packed["wts"], packed["gam"], packed["vec"])

    output_res = out[:, :y_dim]                   # model0 (pred_res)
    output_noise = out[:, feat:feat + y_dim]      # model1 (pred_noise)
    return output_res, output_noise


# --------------------------- pure-JAX reference -----------------------------

def reference_forward(x, y, t, fp_x, p_list, *, n_embed):
    B, C, H, W = x.shape
    gap = jnp.mean(x.reshape(B, C, H * W), axis=-1)
    onehot = jax.nn.one_hot(t, n_embed, dtype=jnp.float32)
    outs = []
    for p in p_list:
        xe = gap @ p["w_enc"] + p["b_enc"]
        xe = _bn_train(xe, p["bn_w"][0:1], p["bn_b"][0:1])
        g1 = onehot @ p["emb1"]
        g2 = onehot @ p["emb2"]
        g3 = onehot @ p["emb3"]
        h = y @ p["w1_y"] + fp_x @ p["w1_fp"] + p["b1"]
        h = g1 * h
        h = _softplus(_bn_train(h, p["bn_w"][1:2], p["bn_b"][1:2]))
        h = xe * h
        h = g2 * (h @ p["w2"] + p["b2"])
        h = _softplus(_bn_train(h, p["bn_w"][2:3], p["bn_b"][2:3]))
        h = g3 * (h @ p["w3"] + p["b3"])
        h = _softplus(_bn_train(h, p["bn_w"][3:4], p["bn_b"][3:4]))
        outs.append(h @ p["w4"] + p["b4"])
    return outs[0], outs[1]


# ----------------------------------- main -----------------------------------

if __name__ == "__main__":
    key = jax.random.PRNGKey(0)
    B, C, H, W = 8, 3, 16, 16           # B=8 -> full sublanes
    y_dim, fp_dim, feat = 10, 128, 128  # feature_dim=128 -> lane/MXU aligned
    n_steps = 8
    n_embed = n_steps + 1               # module does n_steps + 1 internally
    din = y_dim + fp_dim                # guidance=True -> lin1 input width

    keys = jax.random.split(key, 6)
    x = jax.random.normal(keys[0], (B, C, H, W), jnp.float32)
    y = jax.random.normal(keys[1], (B, y_dim), jnp.float32)
    fp_x = jax.random.normal(keys[2], (B, fp_dim), jnp.float32)
    t = jax.random.randint(keys[3], (B,), 0, n_embed)

    def lin_init(k, fan_in, fan_out):
        bound = 1.0 / (fan_in ** 0.5)
        kw, kb = jax.random.split(k)
        wt = jax.random.uniform(kw, (fan_in, fan_out), jnp.float32, -bound, bound)
        bs = jax.random.uniform(kb, (1, fan_out), jnp.float32, -bound, bound)
        return wt, bs

    def make_model_params(k):
        ks = jax.random.split(k, 8)
        w_enc, b_enc = lin_init(ks[0], C, feat)
        w1, b1 = lin_init(ks[1], din, feat)      # Linear(y_dim+fp_dim, feat)
        w2, b2 = lin_init(ks[2], feat, feat)
        w3, b3 = lin_init(ks[3], feat, feat)
        w4, b4 = lin_init(ks[4], feat, y_dim)
        return dict(
            w_enc=w_enc, b_enc=b_enc,
            w1_y=w1[:y_dim], w1_fp=w1[y_dim:], b1=b1,
            w2=w2, b2=b2, w3=w3, b3=b3, w4=w4, b4=b4,
            # Embedding weights: .uniform_() in __init__ -> U[0, 1)
            emb1=jax.random.uniform(ks[5], (n_embed, feat), jnp.float32),
            emb2=jax.random.uniform(ks[6], (n_embed, feat), jnp.float32),
            emb3=jax.random.uniform(ks[7], (n_embed, feat), jnp.float32),
            # BatchNorm1d default affine init: weight=1, bias=0
            bn_w=jnp.ones((4, feat), jnp.float32),
            bn_b=jnp.zeros((4, feat), jnp.float32),
        )

    p0 = make_model_params(keys[4])   # model0 (pred_res)
    p1 = make_model_params(keys[5])   # model1 (pred_noise)

    packed = pack_params(p0, p1, hw=H * W, feat=feat, n_embed=n_embed)
    packed = jax.block_until_ready(packed)

    out_res, out_noise = directional_forward(x, y, t, fp_x, packed,
                                             y_dim=y_dim, feat=feat)
    out_res = jax.block_until_ready(out_res)
    out_noise = jax.block_until_ready(out_noise)

    ref_res, ref_noise = reference_forward(x, y, t, fp_x, [p0, p1], n_embed=n_embed)
    ref_res = jax.block_until_ready(ref_res)
    ref_noise = jax.block_until_ready(ref_noise)

    assert out_res.shape == (B, y_dim) and out_noise.shape == (B, y_dim)
    assert jnp.allclose(out_res, ref_res, atol=1e-3, rtol=1e-3)
    assert jnp.allclose(out_noise, ref_noise, atol=1e-3, rtol=1e-3)

    print("KERNEL_OK")
</pallas_src>

<mosaic_0001>
module attributes {stable_mosaic.version = 11 : i64} {
  func.func @kernel(%arg0: memref<8x1152xf32, #tpu.memory_space<vmem>>, %arg1: memref<1792x256xf32, #tpu.memory_space<vmem>>, %arg2: memref<128x768xf32, #tpu.memory_space<vmem>>, %arg3: memref<16x256xf32, #tpu.memory_space<vmem>>, %arg4: memref<8x256xf32, #tpu.memory_space<vmem>>) attributes {dimension_semantics = [], scalar_prefetch = 0 : i64, scratch_operands = 0 : i64, tpu.core_type = #tpu.core_type<tc>} {
    %c0 = arith.constant 0 : index
    %c0_0 = arith.constant 0 : index
    %0 = vector.load %arg0[%c0, %c0_0] : memref<8x1152xf32, #tpu.memory_space<vmem>>, vector<8x768xf32>
    %c0_1 = arith.constant 0 : index
    %c768 = arith.constant 768 : index
    %1 = vector.load %arg0[%c0_1, %c768] : memref<8x1152xf32, #tpu.memory_space<vmem>>, vector<8x128xf32>
    %c0_2 = arith.constant 0 : index
    %c896 = arith.constant 896 : index
    %2 = vector.load %arg0[%c0_2, %c896] : memref<8x1152xf32, #tpu.memory_space<vmem>>, vector<8x128xf32>
    %c0_3 = arith.constant 0 : index
    %c1024 = arith.constant 1024 : index
    %3 = vector.load %arg0[%c0_3, %c1024] : memref<8x1152xf32, #tpu.memory_space<vmem>>, vector<8x128xf32>
    %c0_4 = arith.constant 0 : index
    %c0_5 = arith.constant 0 : index
    %4 = vector.load %arg3[%c0_4, %c0_5] : memref<16x256xf32, #tpu.memory_space<vmem>>, vector<16x256xf32>
    %c0_6 = arith.constant 0 : index
    %c0_7 = arith.constant 0 : index
    %5 = vector.load %arg2[%c0_6, %c0_7] : memref<128x768xf32, #tpu.memory_space<vmem>>, vector<128x768xf32>
    %cst = arith.constant dense<0.000000e+00> : vector<8x768xf32>
    %6 = tpu.matmul %3, %5, %cst {dimension_numbers = #tpu.dot_dimension_numbers<[1], [0], [0], [1], [0, 0, 1, 1], [], []>} : vector<8x128xf32>, vector<128x768xf32>, vector<8x768xf32> -> vector<8x768xf32>
    %7 = vector.extract_strided_slice %6 {offsets = [0, 0], sizes = [8, 256], strides = [1, 1]} : vector<8x768xf32> to vector<8x256xf32>
    %8 = vector.extract_strided_slice %6 {offsets = [0, 256], sizes = [8, 256], strides = [1, 1]} : vector<8x768xf32> to vector<8x256xf32>
    %9 = vector.extract_strided_slice %6 {offsets = [0, 512], sizes = [8, 256], strides = [1, 1]} : vector<8x768xf32> to vector<8x256xf32>
    %c0_8 = arith.constant 0 : index
    %c0_9 = arith.constant 0 : index
    %10 = vector.load %arg1[%c0_8, %c0_9] : memref<1792x256xf32, #tpu.memory_space<vmem>>, vector<768x256xf32>
    %cst_10 = arith.constant dense<0.000000e+00> : vector<8x256xf32>
    %11 = tpu.matmul %0, %10, %cst_10 {dimension_numbers = #tpu.dot_dimension_numbers<[1], [0], [0], [1], [0, 0, 1, 1], [], []>} : vector<8x768xf32>, vector<768x256xf32>, vector<8x256xf32> -> vector<8x256xf32>
    %12 = vector.extract_strided_slice %4 {offsets = [0, 0], sizes = [1, 256], strides = [1, 1]} : vector<16x256xf32> to vector<1x256xf32>
    %13 = vector.broadcast %12 : vector<1x256xf32> to vector<8x256xf32>
    %14 = arith.addf %11, %13 : vector<8x256xf32>
    %15 = vector.extract_strided_slice %4 {offsets = [5, 0], sizes = [1, 256], strides = [1, 1]} : vector<16x256xf32> to vector<1x256xf32>
    %16 = vector.extract_strided_slice %4 {offsets = [9, 0], sizes = [1, 256], strides = [1, 1]} : vector<16x256xf32> to vector<1x256xf32>
    %cst_11 = arith.constant dense<0.000000e+00> : vector<256xf32>
    %17 = vector.multi_reduction <add>, %14, %cst_11 [0] : vector<8x256xf32> to vector<256xf32>
    %18 = vector.shape_cast %17 : vector<256xf32> to vector<1x256xf32>
    %cst_12 = arith.constant 8.000000e+00 : f32
    %19 = vector.broadcast %cst_12 : f32 to vector<1x256xf32>
    %20 = arith.divf %18, %19 : vector<1x256xf32>
    %21 = arith.mulf %14, %14 : vector<8x256xf32>
    %cst_13 = arith.constant dense<0.000000e+00> : vector<256xf32>
    %22 = vector.multi_reduction <add>, %21, %cst_13 [0] : vector<8x256xf32> to vector<256xf32>
    %23 = vector.shape_cast %22 : vector<256xf32> to vector<1x256xf32>
    %cst_14 = arith.constant 8.000000e+00 : f32
    %24 = vector.broadcast %cst_14 : f32 to vector<1x256xf32>
    %25 = arith.divf %23, %24 : vector<1x256xf32>
    %26 = arith.mulf %20, %20 : vector<1x256xf32>
    %27 = arith.subf %25, %26 : vector<1x256xf32>
    %cst_15 = arith.constant 0.000000e+00 : f32
    %28 = vector.broadcast %cst_15 : f32 to vector<1x256xf32>
    %29 = arith.maximumf %27, %28 : vector<1x256xf32>
    %30 = vector.broadcast %20 : vector<1x256xf32> to vector<8x256xf32>
    %31 = arith.subf %14, %30 : vector<8x256xf32>
    %cst_16 = arith.constant 9.99999974E-6 : f32
    %32 = vector.broadcast %cst_16 : f32 to vector<1x256xf32>
    %33 = arith.addf %29, %32 : vector<1x256xf32>
    %34 = math.rsqrt %33 : vector<1x256xf32>
    %35 = vector.broadcast %34 : vector<1x256xf32> to vector<8x256xf32>
    %36 = arith.mulf %31, %35 : vector<8x256xf32>
    %37 = vector.broadcast %15 : vector<1x256xf32> to vector<8x256xf32>
    %38 = arith.mulf %36, %37 : vector<8x256xf32>
    %39 = vector.broadcast %16 : vector<1x256xf32> to vector<8x256xf32>
    %40 = arith.addf %38, %39 : vector<8x256xf32>
    %c768_17 = arith.constant 768 : index
    %c0_18 = arith.constant 0 : index
    %41 = vector.load %arg1[%c768_17, %c0_18] : memref<1792x256xf32, #tpu.memory_space<vmem>>, vector<128x256xf32>
    %cst_19 = arith.constant dense<0.000000e+00> : vector<8x256xf32>
    %42 = tpu.matmul %1, %41, %cst_19 {dimension_numbers = #tpu.dot_dimension_numbers<[1], [0], [0], [1], [0, 0, 1, 1], [], []>} : vector<8x128xf32>, vector<128x256xf32>, vector<8x256xf32> -> vector<8x256xf32>
    %c896_20 = arith.constant 896 : index
    %c0_21 = arith.constant 0 : index
    %43 = vector.load %arg1[%c896_20, %c0_21] : memref<1792x256xf32, #tpu.memory_space<vmem>>, vector<128x256xf32>
    %cst_22 = arith.constant dense<0.000000e+00> : vector<8x256xf32>
    %44 = tpu.matmul %2, %43, %cst_22 {dimension_numbers = #tpu.dot_dimension_numbers<[1], [0], [0], [1], [0, 0, 1, 1], [], []>} : vector<8x128xf32>, vector<128x256xf32>, vector<8x256xf32> -> vector<8x256xf32>
    %45 = arith.addf %42, %44 : vector<8x256xf32>
    %46 = vector.extract_strided_slice %4 {offsets = [1, 0], sizes = [1, 256], strides = [1, 1]} : vector<16x256xf32> to vector<1x256xf32>
    %47 = vector.broadcast %46 : vector<1x256xf32> to vector<8x256xf32>
    %48 = arith.addf %45, %47 : vector<8x256xf32>
    %49 = arith.mulf %7, %48 : vector<8x256xf32>
    %50 = vector.extract_strided_slice %4 {offsets = [6, 0], sizes = [1, 256], strides = [1, 1]} : vector<16x256xf32> to vector<1x256xf32>
    %51 = vector.extract_strided_slice %4 {offsets = [10, 0], sizes = [1, 256], strides = [1, 1]} : vector<16x256xf32> to vector<1x256xf32>
    %cst_23 = arith.constant dense<0.000000e+00> : vector<256xf32>
    %52 = vector.multi_reduction <add>, %49, %cst_23 [0] : vector<8x256xf32> to vector<256xf32>
    %53 = vector.shape_cast %52 : vector<256xf32> to vector<1x256xf32>
    %cst_24 = arith.constant 8.000000e+00 : f32
    %54 = vector.broadcast %cst_24 : f32 to vector<1x256xf32>
    %55 = arith.divf %53, %54 : vector<1x256xf32>
    %56 = arith.mulf %49, %49 : vector<8x256xf32>
    %cst_25 = arith.constant dense<0.000000e+00> : vector<256xf32>
    %57 = vector.multi_reduction <add>, %56, %cst_25 [0] : vector<8x256xf32> to vector<256xf32>
    %58 = vector.shape_cast %57 : vector<256xf32> to vector<1x256xf32>
    %cst_26 = arith.constant 8.000000e+00 : f32
    %59 = vector.broadcast %cst_26 : f32 to vector<1x256xf32>
    %60 = arith.divf %58, %59 : vector<1x256xf32>
    %61 = arith.mulf %55, %55 : vector<1x256xf32>
    %62 = arith.subf %60, %61 : vector<1x256xf32>
    %cst_27 = arith.constant 0.000000e+00 : f32
    %63 = vector.broadcast %cst_27 : f32 to vector<1x256xf32>
    %64 = arith.maximumf %62, %63 : vector<1x256xf32>
    %65 = vector.broadcast %55 : vector<1x256xf32> to vector<8x256xf32>
    %66 = arith.subf %49, %65 : vector<8x256xf32>
    %cst_28 = arith.constant 9.99999974E-6 : f32
    %67 = vector.broadcast %cst_28 : f32 to vector<1x256xf32>
    %68 = arith.addf %64, %67 : vector<1x256xf32>
    %69 = math.rsqrt %68 : vector<1x256xf32>
    %70 = vector.broadcast %69 : vector<1x256xf32> to vector<8x256xf32>
    %71 = arith.mulf %66, %70 : vector<8x256xf32>
    %72 = vector.broadcast %50 : vector<1x256xf32> to vector<8x256xf32>
    %73 = arith.mulf %71, %72 : vector<8x256xf32>
    %74 = vector.broadcast %51 : vector<1x256xf32> to vector<8x256xf32>
    %75 = arith.addf %73, %74 : vector<8x256xf32>
    %cst_29 = arith.constant 0.000000e+00 : f32
    %76 = vector.broadcast %cst_29 : f32 to vector<8x256xf32>
    %77 = arith.maximumf %75, %76 : vector<8x256xf32>
    %78 = math.absf %75 : vector<8x256xf32>
    %cst_30 = arith.constant 0.000000e+00 : f32
    %79 = vector.broadcast %cst_30 : f32 to vector<8x256xf32>
    %80 = arith.subf %79, %78 : vector<8x256xf32>
    %81 = math.exp %80 : vector<8x256xf32>
    %82 = math.log1p %81 : vector<8x256xf32>
    %83 = arith.addf %77, %82 : vector<8x256xf32>
    %84 = arith.mulf %40, %83 : vector<8x256xf32>
    %c1024_31 = arith.constant 1024 : index
    %c0_32 = arith.constant 0 : index
    %85 = vector.load %arg1[%c1024_31, %c0_32] : memref<1792x256xf32, #tpu.memory_space<vmem>>, vector<256x256xf32>
    %cst_33 = arith.constant dense<0.000000e+00> : vector<8x256xf32>
    %86 = tpu.matmul %84, %85, %cst_33 {dimension_numbers = #tpu.dot_dimension_numbers<[1], [0], [0], [1], [0, 0, 1, 1], [], []>} : vector<8x256xf32>, vector<256x256xf32>, vector<8x256xf32> -> vector<8x256xf32>
    %87 = vector.extract_strided_slice %4 {offsets = [2, 0], sizes = [1, 256], strides = [1, 1]} : vector<16x256xf32> to vector<1x256xf32>
    %88 = vector.broadcast %87 : vector<1x256xf32> to vector<8x256xf32>
    %89 = arith.addf %86, %88 : vector<8x256xf32>
    %90 = arith.mulf %8, %89 : vector<8x256xf32>
    %91 = vector.extract_strided_slice %4 {offsets = [7, 0], sizes = [1, 256], strides = [1, 1]} : vector<16x256xf32> to vector<1x256xf32>
    %92 = vector.extract_strided_slice %4 {offsets = [11, 0], sizes = [1, 256], strides = [1, 1]} : vector<16x256xf32> to vector<1x256xf32>
    %cst_34 = arith.constant dense<0.000000e+00> : vector<256xf32>
    %93 = vector.multi_reduction <add>, %90, %cst_34 [0] : vector<8x256xf32> to vector<256xf32>
    %94 = vector.shape_cast %93 : vector<256xf32> to vector<1x256xf32>
    %cst_35 = arith.constant 8.000000e+00 : f32
    %95 = vector.broadcast %cst_35 : f32 to vector<1x256xf32>
    %96 = arith.divf %94, %95 : vector<1x256xf32>
    %97 = arith.mulf %90, %90 : vector<8x256xf32>
    %cst_36 = arith.constant dense<0.000000e+00> : vector<256xf32>
    %98 = vector.multi_reduction <add>, %97, %cst_36 [0] : vector<8x256xf32> to vector<256xf32>
    %99 = vector.shape_cast %98 : vector<256xf32> to vector<1x256xf32>
    %cst_37 = arith.constant 8.000000e+00 : f32
    %100 = vector.broadcast %cst_37 : f32 to vector<1x256xf32>
    %101 = arith.divf %99, %100 : vector<1x256xf32>
    %102 = arith.mulf %96, %96 : vector<1x256xf32>
    %103 = arith.subf %101, %102 : vector<1x256xf32>
    %cst_38 = arith.constant 0.000000e+00 : f32
    %104 = vector.broadcast %cst_38 : f32 to vector<1x256xf32>
    %105 = arith.maximumf %103, %104 : vector<1x256xf32>
    %106 = vector.broadcast %96 : vector<1x256xf32> to vector<8x256xf32>
    %107 = arith.subf %90, %106 : vector<8x256xf32>
    %cst_39 = arith.constant 9.99999974E-6 : f32
    %108 = vector.broadcast %cst_39 : f32 to vector<1x256xf32>
    %109 = arith.addf %105, %108 : vector<1x256xf32>
    %110 = math.rsqrt %109 : vector<1x256xf32>
    %111 = vector.broadcast %110 : vector<1x256xf32> to vector<8x256xf32>
    %112 = arith.mulf %107, %111 : vector<8x256xf32>
    %113 = vector.broadcast %91 : vector<1x256xf32> to vector<8x256xf32>
    %114 = arith.mulf %112, %113 : vector<8x256xf32>
    %115 = vector.broadcast %92 : vector<1x256xf32> to vector<8x256xf32>
    %116 = arith.addf %114, %115 : vector<8x256xf32>
    %cst_40 = arith.constant 0.000000e+00 : f32
    %117 = vector.broadcast %cst_40 : f32 to vector<8x256xf32>
    %118 = arith.maximumf %116, %117 : vector<8x256xf32>
    %119 = math.absf %116 : vector<8x256xf32>
    %cst_41 = arith.constant 0.000000e+00 : f32
    %120 = vector.broadcast %cst_41 : f32 to vector<8x256xf32>
    %121 = arith.subf %120, %119 : vector<8x256xf32>
    %122 = math.exp %121 : vector<8x256xf32>
    %123 = math.log1p %122 : vector<8x256xf32>
    %124 = arith.addf %118, %123 : vector<8x256xf32>
    %c1280 = arith.constant 1280 : index
    %c0_42 = arith.constant 0 : index
    %125 = vector.load %arg1[%c1280, %c0_42] : memref<1792x256xf32, #tpu.memory_space<vmem>>, vector<256x256xf32>
    %cst_43 = arith.constant dense<0.000000e+00> : vector<8x256xf32>
    %126 = tpu.matmul %124, %125, %cst_43 {dimension_numbers = #tpu.dot_dimension_numbers<[1], [0], [0], [1], [0, 0, 1, 1], [], []>} : vector<8x256xf32>, vector<256x256xf32>, vector<8x256xf32> -> vector<8x256xf32>
    %127 = vector.extract_strided_slice %4 {offsets = [3, 0], sizes = [1, 256], strides = [1, 1]} : vector<16x256xf32> to vector<1x256xf32>
    %128 = vector.broadcast %127 : vector<1x256xf32> to vector<8x256xf32>
    %129 = arith.addf %126, %128 : vector<8x256xf32>
    %130 = arith.mulf %9, %129 : vector<8x256xf32>
    %131 = vector.extract_strided_slice %4 {offsets = [8, 0], sizes = [1, 256], strides = [1, 1]} : vector<16x256xf32> to vector<1x256xf32>
    %132 = vector.extract_strided_slice %4 {offsets = [12, 0], sizes = [1, 256], strides = [1, 1]} : vector<16x256xf32> to vector<1x256xf32>
    %cst_44 = arith.constant dense<0.000000e+00> : vector<256xf32>
    %133 = vector.multi_reduction <add>, %130, %cst_44 [0] : vector<8x256xf32> to vector<256xf32>
    %134 = vector.shape_cast %133 : vector<256xf32> to vector<1x256xf32>
    %cst_45 = arith.constant 8.000000e+00 : f32
    %135 = vector.broadcast %cst_45 : f32 to vector<1x256xf32>
    %136 = arith.divf %134, %135 : vector<1x256xf32>
    %137 = arith.mulf %130, %130 : vector<8x256xf32>
    %cst_46 = arith.constant dense<0.000000e+00> : vector<256xf32>
    %138 = vector.multi_reduction <add>, %137, %cst_46 [0] : vector<8x256xf32> to vector<256xf32>
    %139 = vector.shape_cast %138 : vector<256xf32> to vector<1x256xf32>
    %cst_47 = arith.constant 8.000000e+00 : f32
    %140 = vector.broadcast %cst_47 : f32 to vector<1x256xf32>
    %141 = arith.divf %139, %140 : vector<1x256xf32>
    %142 = arith.mulf %136, %136 : vector<1x256xf32>
    %143 = arith.subf %141, %142 : vector<1x256xf32>
    %cst_48 = arith.constant 0.000000e+00 : f32
    %144 = vector.broadcast %cst_48 : f32 to vector<1x256xf32>
    %145 = arith.maximumf %143, %144 : vector<1x256xf32>
    %146 = vector.broadcast %136 : vector<1x256xf32> to vector<8x256xf32>
    %147 = arith.subf %130, %146 : vector<8x256xf32>
    %cst_49 = arith.constant 9.99999974E-6 : f32
    %148 = vector.broadcast %cst_49 : f32 to vector<1x256xf32>
    %149 = arith.addf %145, %148 : vector<1x256xf32>
    %150 = math.rsqrt %149 : vector<1x256xf32>
    %151 = vector.broadcast %150 : vector<1x256xf32> to vector<8x256xf32>
    %152 = arith.mulf %147, %151 : vector<8x256xf32>
    %153 = vector.broadcast %131 : vector<1x256xf32> to vector<8x256xf32>
    %154 = arith.mulf %152, %153 : vector<8x256xf32>
    %155 = vector.broadcast %132 : vector<1x256xf32> to vector<8x256xf32>
    %156 = arith.addf %154, %155 : vector<8x256xf32>
    %cst_50 = arith.constant 0.000000e+00 : f32
    %157 = vector.broadcast %cst_50 : f32 to vector<8x256xf32>
    %158 = arith.maximumf %156, %157 : vector<8x256xf32>
    %159 = math.absf %156 : vector<8x256xf32>
    %cst_51 = arith.constant 0.000000e+00 : f32
    %160 = vector.broadcast %cst_51 : f32 to vector<8x256xf32>
    %161 = arith.subf %160, %159 : vector<8x256xf32>
    %162 = math.exp %161 : vector<8x256xf32>
    %163 = math.log1p %162 : vector<8x256xf32>
    %164 = arith.addf %158, %163 : vector<8x256xf32>
    %c1536 = arith.constant 1536 : index
    %c0_52 = arith.constant 0 : index
    %165 = vector.load %arg1[%c1536, %c0_52] : memref<1792x256xf32, #tpu.memory_space<vmem>>, vector<256x256xf32>
    %cst_53 = arith.constant dense<0.000000e+00> : vector<8x256xf32>
    %166 = tpu.matmul %164, %165, %cst_53 {dimension_numbers = #tpu.dot_dimension_numbers<[1], [0], [0], [1], [0, 0, 1, 1], [], []>} : vector<8x256xf32>, vector<256x256xf32>, vector<8x256xf32> -> vector<8x256xf32>
    %167 = vector.extract_strided_slice %4 {offsets = [4, 0], sizes = [1, 256], strides = [1, 1]} : vector<16x256xf32> to vector<1x256xf32>
    %168 = vector.broadcast %167 : vector<1x256xf32> to vector<8x256xf32>
    %169 = arith.addf %166, %168 : vector<8x256xf32>
    %c0_54 = arith.constant 0 : index
    %c0_55 = arith.constant 0 : index
    %170 = vector.load %arg4[%c0_54, %c0_55] : memref<8x256xf32, #tpu.memory_space<vmem>>, vector<8x256xf32>
    tpu.vector_store %arg4[%c0_54, %c0_55], %169 {strides = array<i32>} : memref<8x256xf32, #tpu.memory_space<vmem>>, vector<8x256xf32>,
    return
  }
}

</mosaic_0001>

<bundles_post_ra>
// kernel: tpu_custom_call.1
= control target key start
LH: loop header
LB: loop body
LE: loop exit
PB: predicated region body
PF: predicated region fallthrough
CT: control target
= control target key end

     0   :  { %9 = vsyncpa [#allocation3], 0  ;;  %s2782_s0 = inlined_call_operand.hbm [shape: f32[8,1152], index: 0, kind: input, shape index: {}]   ;;  %s2783_s1 = inlined_call_operand.hbm [shape: f32[1792,256], index: 1, kind: input, shape index: {}]   ;;  %s2784_s2 = inlined_call_operand.hbm [shape: f32[128,768], index: 2, kind: input, shape index: {}]   ;;  %s2785_s3 = inlined_call_operand.hbm [shape: f32[16,256], index: 3, kind: input, shape index: {}]   ;;  %s2786_s4 = inlined_call_operand.hbm [shape: f32[8,256], index: 4, kind: output, shape index: {}]  }
   0x1   :  { %10 = vsyncpa [#allocation6], 0 }
   0x2   :  { %11 = vsyncpa [#allocation9], 0 }
   0x3   :  { %12 = vsyncpa [#allocation4], 0  ;;  %s2549_s15 = smov [#allocation5]   ;;  %s2431_s19 = scalar_lea.hbm %s2783_s1, 57344 }
   0x4   :  { %s28_s16 = sshll.u32 %s2549_s15, 4  ;;  %p2432_p0 = scmp.ne.s32.totalorder %s2783_s1, %s2431_s19  ;;  %s29_s16 = int_to_ptr.vmem [resolvable:$true] %s28_s16 }
   0x5   :  { %p2435_p1 = scmp.lt.u32.totalorder %s2431_s19, %s2783_s1 }
   0x7   :  { %p2437_p2 = pnand %p2435_p1, %p2432_p0 }
   0x9   :  { %2440 = shalt.err (!%p2437_p2)
}
   0xa   :  { %s2441_s24 = scalar_lea.vmem %s29_s16, 57344  ;;  %p2446_p4 = scmp.lt.s32.totalorder %s29_s16, %s29_s16 }
   0xb   :  { %p2442_p3 = scmp.ne.s32.totalorder %s29_s16, %s2441_s24  ;;  %p2447_p5 = scmp.lt.s32.totalorder %s2441_s24, %s2441_s24 }
   0xd   :  { %p2448_p6 = por %p2447_p5, %p2446_p4 }
   0xf   :  { %p2449_p7 = pnand %p2448_p6, %p2442_p3 }
  0x11   :  { %2452 = shalt.err (!%p2449_p7)
}
  0x12   :  { %s2550_s25 = smov 256   ;;  %s2551_s26 = smov 16  }
  0x13   :  { %34 = dma.hbm_to_vmem [thread:$0]  %s2783_s1, 57344, %s29_s16, [#allocation6], %s2550_s25, %s2550_s25, %s2551_s26  }
  0x14   :  { %s2552_s29 = smov [#allocation2]   ;;  %s2553_s5 = smov [#allocation7]  }
  0x15   :  { %s19_s30 = sshll.u32 %s2552_s29, 4  ;;  %s40_s6 = sshll.u32 %s2553_s5, 4  ;;  %s20_s30 = int_to_ptr.vmem [resolvable:$true] %s19_s30  ;;  %s41_s6 = int_to_ptr.vmem [resolvable:$true] %s40_s6 }
  0x16   :  { %s2453_s9 = scalar_lea.hbm %s2782_s0, 1152 }
  0x17   :  { %p2454_p8 = scmp.ne.s32.totalorder %s2782_s0, %s2453_s9  ;;  %p2457_p9 = scmp.lt.u32.totalorder %s2453_s9, %s2782_s0 }
  0x19   :  { %p2459_p10 = pnand %p2457_p9, %p2454_p8 }
  0x1b   :  { %2462 = shalt.err (!%p2459_p10)
}
  0x1c   :  { %s2463_s1 = scalar_lea.vmem %s20_s30, 1152  ;;  %p2468_p12 = scmp.lt.s32.totalorder %s20_s30, %s20_s30 }
  0x1d   :  { %p2464_p11 = scmp.ne.s32.totalorder %s20_s30, %s2463_s1  ;;  %p2469_p13 = scmp.lt.s32.totalorder %s2463_s1, %s2463_s1 }
  0x1f   :  { %p2470_p0 = por %p2469_p13, %p2468_p12 }
  0x21   :  { %p2471_p1 = pnand %p2470_p0, %p2464_p11 }
  0x23   :  { %2474 = shalt.err (!%p2471_p1)
}
  0x24   :  { %22 = dma.hbm_to_vmem [thread:$0]  %s2782_s0, 1152, %s20_s30, [#allocation3]  }
  0x25   :  { %s2475_s18 = scalar_lea.hbm %s2784_s2, 12288 }
  0x26   :  { %p2476_p2 = scmp.ne.s32.totalorder %s2784_s2, %s2475_s18  ;;  %p2479_p3 = scmp.lt.u32.totalorder %s2475_s18, %s2784_s2 }
  0x28   :  { %p2481_p4 = pnand %p2479_p3, %p2476_p2 }
  0x2a   :  { %2484 = shalt.err (!%p2481_p4)
}
  0x2b   :  { %s2485_s23 = scalar_lea.vmem %s41_s6, 12288  ;;  %p2490_p6 = scmp.lt.s32.totalorder %s41_s6, %s41_s6 }
  0x2c   :  { %p2486_p5 = scmp.ne.s32.totalorder %s41_s6, %s2485_s23  ;;  %p2491_p7 = scmp.lt.s32.totalorder %s2485_s23, %s2485_s23 }
  0x2e   :  { %p2492_p8 = por %p2491_p7, %p2490_p6 }
  0x30   :  { %p2493_p9 = pnand %p2492_p8, %p2486_p5 }
  0x32   :  { %2496 = shalt.err (!%p2493_p9)
}
  0x33   :  { %s2554_s0 = smov 768   ;;  %s2555_s24 = smov 48  }
  0x34   :  { %46 = dma.hbm_to_vmem [thread:$0]  %s2784_s2, 12288, %s41_s6, [#allocation6], %s2554_s0, %s2554_s0, %s2555_s24  }
  0x35   :  { %s2556_s29 = smov [#allocation8]   ;;  %s2497_s8 = scalar_lea.hbm %s2785_s3, 512 }
  0x36   :  { %s52_s30 = sshll.u32 %s2556_s29, 4  ;;  %p2498_p10 = scmp.ne.s32.totalorder %s2785_s3, %s2497_s8  ;;  %s53_s30 = int_to_ptr.vmem [resolvable:$true] %s52_s30 }
  0x37   :  { %p2501_p11 = scmp.lt.u32.totalorder %s2497_s8, %s2785_s3 }
  0x39   :  { %p2503_p12 = pnand %p2501_p11, %p2498_p10 }
  0x3b   :  { %2506 = shalt.err (!%p2503_p12)
}
  0x3c   :  { %s2507_s13 = scalar_lea.vmem %s53_s30, 512  ;;  %p2512_p0 = scmp.lt.s32.totalorder %s53_s30, %s53_s30 }
  0x3d   :  { %p2508_p13 = scmp.ne.s32.totalorder %s53_s30, %s2507_s13  ;;  %p2513_p1 = scmp.lt.s32.totalorder %s2507_s13, %s2507_s13 }
  0x3f   :  { %p2514_p2 = por %p2513_p1, %p2512_p0 }
  0x41   :  { %p2515_p3 = pnand %p2514_p2, %p2508_p13 }
  0x43   :  { %2518 = shalt.err (!%p2515_p3)
}
  0x44   :  { %58 = dma.hbm_to_vmem [thread:$0]  %s2785_s3, 512, %s53_s30, [#allocation9], %s2550_s25, %s2550_s25, %s2551_s26  }
  0x45   :  { %2541 = dma.done.wait [#allocation3], 1152  }
  0x46   :  { %2542 = vsyncadd [#allocation3], 4294966144 }
  0x47   :  { %2543 = dma.done.wait [#allocation6], 69632  }
  0x48   :  { %2544 = vsyncadd [#allocation6], 4294897664 }
  0x49   :  { %2545 = dma.done.wait [#allocation9], 512  }
  0x4a   :  { %2546 = vsyncadd [#allocation9], 4294966784  ;;  %v2557_v0 = vmov 0.0   ;;  %v85_v1 = vld [vmem:[#allocation7 + $0x8] sm:$0xff]  ;;  %v91_v2 = vld [vmem:[#allocation7 + $0x38] sm:$0xff]  ;;  %s2558_s3 = smov [#allocation10]  }
  0x4b   :  { %315 = vmatprep.mubr.f32.mxu1 %v2557_v0  ;;  %244 = vmatprep.mubr.f32.mxu0 %v2557_v0  ;;  %v87_v3 = vld [vmem:[#allocation7 + $0x18] sm:$0xff]  ;;  %v1825_v4 = vpack.c.bf16 %v91_v2, %v85_v1  ;;  %v93_v5 = vld [vmem:[#allocation7 + $0x48] sm:$0xff]  ;;  %v84_v6 = vld [vmem:[#allocation7] sm:$0xff]  ;;  %s1814_s25 = sshll.u32 %s2558_s3, 4  ;;  %s1815_s25 = int_to_ptr.vmem [resolvable:$true] %s1814_s25 }
  0x4c   :  { %v90_v7 = vld [vmem:[#allocation7 + $0x30] sm:$0xff]  ;;  %v1857_v8 = vpack.c.bf16 %v93_v5, %v87_v3  ;;  %v92_v11 = vld [vmem:[#allocation7 + $0x40] sm:$0xff]  ;;  %v97_v12 = vld [vmem:[#allocation7 + $0x68] sm:$0xff]  ;;  %s2519_s26 = scalar_lea.vmem %s1815_s25, 256  ;;  %p2524_p5 = scmp.lt.s32.totalorder %s1815_s25, %s1815_s25 }
  0x4d   :  { %v1827_v9 = vpack.c.bf16 %v90_v7, %v84_v6  ;;  %v86_v10 = vld [vmem:[#allocation7 + $0x10] sm:$0xff]  ;;  %1826 = vmatprep.subr.bf16.mxu0 %v1825_v4  ;;  %v103_v14 = vld [vmem:[#allocation7 + $0x98] sm:$0xff]  ;;  %v105_v16 = vld [vmem:[#allocation7 + $0xa8] sm:$0xff]  ;;  %p2520_p4 = scmp.ne.s32.totalorder %s1815_s25, %s2519_s26  ;;  %p2525_p6 = scmp.lt.s32.totalorder %s2519_s26, %s2519_s26 }
  0x4e   :  { %v1859_v13 = vpack.c.bf16 %v92_v11, %v86_v10  ;;  %v99_v15 = vld [vmem:[#allocation7 + $0x78] sm:$0xff]  ;;  %1858 = vmatprep.subr.bf16.mxu1 %v1857_v8  ;;  %v1829_v17 = vpack.c.bf16 %v103_v14, %v97_v12  ;;  %v96_v19 = vld [vmem:[#allocation7 + $0x60] sm:$0xff]  ;;  %v102_v20 = vld [vmem:[#allocation7 + $0x90] sm:$0xff] }
  0x4f   :  { %1828 = vmatpush1.bf16.msra.mxu0 %v1827_v9  ;;  %v1861_v18 = vpack.c.bf16 %v105_v16, %v99_v15  ;;  %v98_v21 = vld [vmem:[#allocation7 + $0x70] sm:$0xff]  ;;  %v1831_v22 = vpack.c.bf16 %v102_v20, %v96_v19  ;;  %v104_v23 = vld [vmem:[#allocation7 + $0xa0] sm:$0xff]  ;;  %v109_v24 = vld [vmem:[#allocation7 + $0xc8] sm:$0xff]  ;;  %p2526_p7 = por %p2525_p6, %p2524_p5 }
  0x50   :  { %1860 = vmatpush1.bf16.msra.mxu1 %v1859_v13  ;;  %v115_v25 = vld [vmem:[#allocation7 + $0xf8] sm:$0xff]  ;;  %1830 = vmatprep.subr.bf16.mxu0 %v1829_v17  ;;  %v1863_v26 = vpack.c.bf16 %v104_v23, %v98_v21  ;;  %v117_v29 = vld [vmem:[#allocation7 + $0x108] sm:$0xff]  ;;  %v108_v30 = vld [vmem:[#allocation7 + $0xc0] sm:$0xff] }
  0x51   :  { %1862 = vmatprep.subr.bf16.mxu1 %v1861_v18  ;;  %v1833_v27 = vpack.c.bf16 %v115_v25, %v109_v24  ;;  %v111_v28 = vld [vmem:[#allocation7 + $0xd8] sm:$0xff]  ;;  %v114_v32 = vld [vmem:[#allocation7 + $0xf0] sm:$0xff]  ;;  %v116_v34 = vld [vmem:[#allocation7 + $0x100] sm:$0xff]  ;;  %p2527_p8 = pnand %p2526_p7, %p2520_p4 }
  0x52   :  { %v1865_v31 = vpack.c.bf16 %v117_v29, %v111_v28  ;;  %v110_v33 = vld [vmem:[#allocation7 + $0xd0] sm:$0xff]  ;;  %v1835_v35 = vpack.c.bf16 %v114_v32, %v108_v30  ;;  %v121_v36 = vld [vmem:[#allocation7 + $0x128] sm:$0xff]  ;;  %v127_v37 = vld [vmem:[#allocation7 + $0x158] sm:$0xff] }
  0x53   :  { %1832 = vmatpush1.bf16.msra.mxu0 %v1831_v22  ;;  %v123_v38 = vld [vmem:[#allocation7 + $0x138] sm:$0xff]  ;;  %v1867_v39 = vpack.c.bf16 %v116_v34, %v110_v33  ;;  %v1837_v40 = vpack.c.bf16 %v127_v37, %v121_v36  ;;  %v129_v41 = vld [vmem:[#allocation7 + $0x168] sm:$0xff]  ;;  %v120_v42 = vld [vmem:[#allocation7 + $0x120] sm:$0xff] }
  0x54   :  { %1864 = vmatpush1.bf16.msra.mxu1 %v1863_v26  ;;  %1834 = vmatprep.subr.bf16.mxu0 %v1833_v27  ;;  %v126_v43 = vld [vmem:[#allocation7 + $0x150] sm:$0xff]  ;;  %v1869_v44 = vpack.c.bf16 %v129_v41, %v123_v38  ;;  %v128_v46 = vld [vmem:[#allocation7 + $0x160] sm:$0xff]  ;;  %v133_v47 = vld [vmem:[#allocation7 + $0x188] sm:$0xff] }
  0x55   :  { %1866 = vmatprep.subr.bf16.mxu1 %v1865_v31  ;;  %v122_v45 = vld [vmem:[#allocation7 + $0x130] sm:$0xff]  ;;  %v139_v48 = vld [vmem:[#allocation7 + $0x1b8] sm:$0xff]  ;;  %v141_v50 = vld [vmem:[#allocation7 + $0x1c8] sm:$0xff]  ;;  %v1839_v51 = vpack.c.bf16 %v126_v43, %v120_v42 }
  0x56   :  { %v135_v49 = vld [vmem:[#allocation7 + $0x198] sm:$0xff]  ;;  %v1871_v52 = vpack.c.bf16 %v128_v46, %v122_v45  ;;  %v1841_v53 = vpack.c.bf16 %v139_v48, %v133_v47  ;;  %v132_v54 = vld [vmem:[#allocation7 + $0x180] sm:$0xff]  ;;  %v138_v55 = vld [vmem:[#allocation7 + $0x1b0] sm:$0xff] }
  0x57   :  { %1836 = vmatpush1.bf16.msra.mxu0 %v1835_v35  ;;  %v134_v56 = vld [vmem:[#allocation7 + $0x190] sm:$0xff]  ;;  %v1873_v57 = vpack.c.bf16 %v141_v50, %v135_v49  ;;  %v140_v58 = vld [vmem:[#allocation7 + $0x1c0] sm:$0xff]  ;;  %v145_v59 = vld [vmem:[#allocation7 + $0x1e8] sm:$0xff]  ;;  %v1843_v63 = vpack.c.bf16 %v138_v55, %v132_v54 }
  0x58   :  { %1868 = vmatpush1.bf16.msra.mxu1 %v1867_v39  ;;  %1838 = vmatprep.subr.bf16.mxu0 %v1837_v40  ;;  %v151_v60 = vld [vmem:[#allocation7 + $0x218] sm:$0xff]  ;;  %v153_v62 = vld [vmem:[#allocation7 + $0x228] sm:$0xff]  ;;  %v1875_v1 = vpack.c.bf16 %v140_v58, %v134_v56  ;;  %v144_v3 = vld [vmem:[#allocation7 + $0x1e0] sm:$0xff] }
  0x59   :  { %1870 = vmatprep.subr.bf16.mxu1 %v1869_v44  ;;  %v147_v61 = vld [vmem:[#allocation7 + $0x1f8] sm:$0xff]  ;;  %v1845_v2 = vpack.c.bf16 %v151_v60, %v145_v59  ;;  %v150_v4 = vld [vmem:[#allocation7 + $0x210] sm:$0xff]  ;;  %v152_v7 = vld [vmem:[#allocation7 + $0x220] sm:$0xff] }
  0x5a   :  { %v146_v5 = vld [vmem:[#allocation7 + $0x1f0] sm:$0xff]  ;;  %v1877_v6 = vpack.c.bf16 %v153_v62, %v147_v61  ;;  %v157_v8 = vld [vmem:[#allocation7 + $0x248] sm:$0xff]  ;;  %v163_v9 = vld [vmem:[#allocation7 + $0x278] sm:$0xff]  ;;  %v1847_v12 = vpack.c.bf16 %v150_v4, %v144_v3 }
  0x5b   :  { %1840 = vmatpush1.bf16.msra.mxu0 %v1839_v51  ;;  %v159_v10 = vld [vmem:[#allocation7 + $0x258] sm:$0xff]  ;;  %v165_v11 = vld [vmem:[#allocation7 + $0x288] sm:$0xff]  ;;  %v1879_v13 = vpack.c.bf16 %v152_v7, %v146_v5  ;;  %v1849_v14 = vpack.c.bf16 %v163_v9, %v157_v8  ;;  %v156_v15 = vld [vmem:[#allocation7 + $0x240] sm:$0xff] }
  0x5c   :  { %1872 = vmatpush1.bf16.msra.mxu1 %v1871_v52  ;;  %1842 = vmatprep.subr.bf16.mxu0 %v1841_v53  ;;  %v162_v16 = vld [vmem:[#allocation7 + $0x270] sm:$0xff]  ;;  %v1881_v18 = vpack.c.bf16 %v165_v11, %v159_v10  ;;  %v164_v19 = vld [vmem:[#allocation7 + $0x280] sm:$0xff]  ;;  %v169_v20 = vld [vmem:[#allocation7 + $0x2a8] sm:$0xff] }
  0x5d   :  { %1874 = vmatprep.subr.bf16.mxu1 %v1873_v57  ;;  %v158_v17 = vld [vmem:[#allocation7 + $0x250] sm:$0xff]  ;;  %v175_v21 = vld [vmem:[#allocation7 + $0x2d8] sm:$0xff]  ;;  %v177_v23 = vld [vmem:[#allocation7 + $0x2e8] sm:$0xff]  ;;  %v1851_v24 = vpack.c.bf16 %v162_v16, %v156_v15 }
  0x5e   :  { %v171_v22 = vld [vmem:[#allocation7 + $0x2b8] sm:$0xff]  ;;  %v1883_v25 = vpack.c.bf16 %v164_v19, %v158_v17  ;;  %v1853_v26 = vpack.c.bf16 %v175_v21, %v169_v20  ;;  %v168_v27 = vld [vmem:[#allocation7 + $0x2a0] sm:$0xff]  ;;  %v174_v28 = vld [vmem:[#allocation7 + $0x2d0] sm:$0xff] }
  0x5f   :  { %1844 = vmatpush1.bf16.msra.mxu0 %v1843_v63  ;;  %v170_v29 = vld [vmem:[#allocation7 + $0x2b0] sm:$0xff]  ;;  %v1885_v30 = vpack.c.bf16 %v177_v23, %v171_v22  ;;  %v176_v31 = vld [vmem:[#allocation7 + $0x2e0] sm:$0xff]  ;;  %v89_v32 = vld [vmem:[#allocation7 + $0x28] sm:$0xff]  ;;  %v1855_v36 = vpack.c.bf16 %v174_v28, %v168_v27 }
  0x60   :  { %1876 = vmatpush1.bf16.msra.mxu1 %v1875_v1  ;;  %1846 = vmatprep.subr.bf16.mxu0 %v1845_v2  ;;  %v95_v33 = vld [vmem:[#allocation7 + $0x58] sm:$0xff]  ;;  %v394_v34 = vld [vmem:[#allocation5 + $0x8] sm:$0xff]  ;;  %v1887_v37 = vpack.c.bf16 %v176_v31, %v170_v29  ;;  %v88_v39 = vld [vmem:[#allocation7 + $0x20] sm:$0xff] }
  0x61   :  { %1878 = vmatprep.subr.bf16.mxu1 %v1877_v6  ;;  %v396_v35 = vld [vmem:[#allocation5 + $0x18] sm:$0xff]  ;;  %v1889_v38 = vpack.c.bf16 %v95_v33, %v89_v32  ;;  %v94_v40 = vld [vmem:[#allocation7 + $0x50] sm:$0xff]  ;;  %v393_v41 = vld [vmem:[#allocation5] sm:$0xff] }
  0x62   :  { %v1921_v42 = vpack.c.bf16 %v396_v35, %v394_v34  ;;  %v395_v43 = vld [vmem:[#allocation5 + $0x10] sm:$0xff]  ;;  %v101_v44 = vld [vmem:[#allocation7 + $0x88] sm:$0xff]  ;;  %v107_v45 = vld [vmem:[#allocation7 + $0xb8] sm:$0xff]  ;;  %v1891_v49 = vpack.c.bf16 %v94_v40, %v88_v39 }
  0x63   :  { %1848 = vmatpush1.bf16.msra.mxu0 %v1847_v12  ;;  %v398_v46 = vld [vmem:[#allocation5 + $0x28] sm:$0xff]  ;;  %v400_v47 = vld [vmem:[#allocation5 + $0x38] sm:$0xff]  ;;  %v1923_v50 = vpack.c.bf16 %v395_v43, %v393_v41  ;;  %v1893_v51 = vpack.c.bf16 %v107_v45, %v101_v44  ;;  %v100_v52 = vld [vmem:[#allocation7 + $0x80] sm:$0xff] }
  0x64   :  { %1880 = vmatpush1.bf16.msra.mxu1 %v1879_v13  ;;  %1850 = vmatprep.subr.bf16.mxu0 %v1849_v14  ;;  %v2640_v48 = vld [vmem:[#allocation2 + $0x40] sm:$0xff]  ;;  %v106_v53 = vld [vmem:[#allocation7 + $0xb0] sm:$0xff]  ;;  %v397_v54 = vld [vmem:[#allocation5 + $0x20] sm:$0xff]  ;;  %v1925_v55 = vpack.c.bf16 %v400_v47, %v398_v46 }
  0x65   :  { %1882 = vmatprep.subr.bf16.mxu1 %v1881_v18  ;;  %v399_v56 = vld [vmem:[#allocation5 + $0x30] sm:$0xff]  ;;  %v113_v57 = vld [vmem:[#allocation7 + $0xe8] sm:$0xff]  ;;  %v119_v58 = vld [vmem:[#allocation7 + $0x118] sm:$0xff]  ;;  %v1895_v61 = vpack.c.bf16 %v106_v53, %v100_v52 }
  0x66   :  { %v402_v59 = vld [vmem:[#allocation5 + $0x48] sm:$0xff]  ;;  %v404_v60 = vld [vmem:[#allocation5 + $0x58] sm:$0xff]  ;;  %v1927_v62 = vpack.c.bf16 %v399_v56, %v397_v54  ;;  %v1897_v63 = vpack.c.bf16 %v119_v58, %v113_v57  ;;  %v112_v1 = vld [vmem:[#allocation7 + $0xe0] sm:$0xff] }
  0x67   :  { %1852 = vmatpush1.bf16.msra.mxu0 %v1851_v24  ;;  %v118_v2 = vld [vmem:[#allocation7 + $0x110] sm:$0xff]  ;;  %v401_v3 = vld [vmem:[#allocation5 + $0x40] sm:$0xff]  ;;  %v1929_v4 = vpack.c.bf16 %v404_v60, %v402_v59  ;;  %v125_v6 = vld [vmem:[#allocation7 + $0x148] sm:$0xff] }
  0x68   :  { %1884 = vmatpush1.bf16.msra.mxu1 %v1883_v25  ;;  %1854 = vmatprep.subr.bf16.mxu0 %v1853_v26  ;;  %v403_v5 = vld [vmem:[#allocation5 + $0x50] sm:$0xff]  ;;  %v131_v7 = vld [vmem:[#allocation7 + $0x178] sm:$0xff]  ;;  %v406_v8 = vld [vmem:[#allocation5 + $0x68] sm:$0xff]  ;;  %v1899_v10 = vpack.c.bf16 %v118_v2, %v112_v1 }
  0x69   :  { %1886 = vmatprep.subr.bf16.mxu1 %v1885_v30  ;;  %v408_v9 = vld [vmem:[#allocation5 + $0x78] sm:$0xff]  ;;  %v1931_v11 = vpack.c.bf16 %v403_v5, %v401_v3  ;;  %v1901_v12 = vpack.c.bf16 %v131_v7, %v125_v6  ;;  %v124_v13 = vld [vmem:[#allocation7 + $0x140] sm:$0xff]  ;;  %v130_v14 = vld [vmem:[#allocation7 + $0x170] sm:$0xff] }
  0x6a   :  { %v405_v15 = vld [vmem:[#allocation5 + $0x60] sm:$0xff]  ;;  %v1933_v16 = vpack.c.bf16 %v408_v9, %v406_v8  ;;  %v407_v17 = vld [vmem:[#allocation5 + $0x70] sm:$0xff]  ;;  %v137_v18 = vld [vmem:[#allocation7 + $0x1a8] sm:$0xff]  ;;  %v1903_v22 = vpack.c.bf16 %v130_v14, %v124_v13 }
  0x6b   :  { %1856 = vmatpush1.bf16.msra.mxu0 %v1855_v36  ;;  %v143_v19 = vld [vmem:[#allocation7 + $0x1d8] sm:$0xff]  ;;  %v410_v20 = vld [vmem:[#allocation5 + $0x88] sm:$0xff]  ;;  %v1935_v23 = vpack.c.bf16 %v407_v17, %v405_v15  ;;  %v136_v25 = vld [vmem:[#allocation7 + $0x1a0] sm:$0xff] }
  0x6c   :  { %1888 = vmatpush1.bf16.msra.mxu1 %v1887_v37  ;;  %1890 = vmatprep.subr.bf16.mxu0 %v1889_v38  ;;  %v412_v21 = vld [vmem:[#allocation5 + $0x98] sm:$0xff]  ;;  %v1905_v24 = vpack.c.bf16 %v143_v19, %v137_v18  ;;  %v142_v26 = vld [vmem:[#allocation7 + $0x1d0] sm:$0xff]  ;;  %v409_v27 = vld [vmem:[#allocation5 + $0x80] sm:$0xff] }
  0x6d   :  { %1922 = vmatprep.subr.bf16.mxu1 %v1921_v42  ;;  %v1937_v28 = vpack.c.bf16 %v412_v21, %v410_v20  ;;  %v411_v29 = vld [vmem:[#allocation5 + $0x90] sm:$0xff]  ;;  %v149_v30 = vld [vmem:[#allocation7 + $0x208] sm:$0xff]  ;;  %v155_v31 = vld [vmem:[#allocation7 + $0x238] sm:$0xff]  ;;  %v1907_v34 = vpack.c.bf16 %v142_v26, %v136_v25 }
  0x6e   :  { %245 = vmatmul.mubr.f32.vlgmr.msra.gmra.mrb[0].mxu0 %v2640_v48  ;;  %v414_v32 = vld [vmem:[#allocation5 + $0xa8] sm:$0xff]  ;;  %v416_v33 = vld [vmem:[#allocation5 + $0xb8] sm:$0xff]  ;;  %v1939_v35 = vpack.c.bf16 %v411_v29, %v409_v27  ;;  %v1909_v36 = vpack.c.bf16 %v155_v31, %v149_v30  ;;  %v148_v37 = vld [vmem:[#allocation7 + $0x200] sm:$0xff] }
  0x6f   :  { %316 = vmatmul.mubr.f32.vlgmr.msra.gmra.mrb[0].mxu1 %v2640_v48  ;;  %1892 = vmatpush1.bf16.msra.mxu0 %v1891_v49  ;;  %v154_v38 = vld [vmem:[#allocation7 + $0x230] sm:$0xff]  ;;  %v413_v39 = vld [vmem:[#allocation5 + $0xa0] sm:$0xff]  ;;  %v1941_v40 = vpack.c.bf16 %v416_v33, %v414_v32  ;;  %v161_v42 = vld [vmem:[#allocation7 + $0x268] sm:$0xff] }
  0x70   :  { %1924 = vmatpush1.bf16.msra.mxu1 %v1923_v50  ;;  %1894 = vmatprep.subr.bf16.mxu0 %v1893_v51  ;;  %v415_v41 = vld [vmem:[#allocation5 + $0xb0] sm:$0xff]  ;;  %v167_v43 = vld [vmem:[#allocation7 + $0x298] sm:$0xff]  ;;  %v418_v44 = vld [vmem:[#allocation5 + $0xc8] sm:$0xff]  ;;  %v1911_v46 = vpack.c.bf16 %v154_v38, %v148_v37 }
  0x71   :  { %1926 = vmatprep.subr.bf16.mxu1 %v1925_v55  ;;  %386 = vmatprep.mubr.f32.mxu0 %v2557_v0  ;;  %v420_v45 = vld [vmem:[#allocation5 + $0xd8] sm:$0xff]  ;;  %v1943_v47 = vpack.c.bf16 %v415_v41, %v413_v39  ;;  %v1913_v49 = vpack.c.bf16 %v167_v43, %v161_v42  ;;  %v160_v50 = vld [vmem:[#allocation7 + $0x260] sm:$0xff]  ;;  %v166_v51 = vld [vmem:[#allocation7 + $0x290] sm:$0xff] }
  0x72   :  { %v417_v52 = vld [vmem:[#allocation5 + $0xc0] sm:$0xff]  ;;  %v1945_v53 = vpack.c.bf16 %v420_v45, %v418_v44  ;;  %v419_v54 = vld [vmem:[#allocation5 + $0xd0] sm:$0xff]  ;;  %v173_v55 = vld [vmem:[#allocation7 + $0x2c8] sm:$0xff]  ;;  %v1915_v59 = vpack.c.bf16 %v166_v51, %v160_v50 }
  0x73   :  { %1896 = vmatpush1.bf16.msra.mxu0 %v1895_v61  ;;  %v179_v56 = vld [vmem:[#allocation7 + $0x2f8] sm:$0xff]  ;;  %v422_v57 = vld [vmem:[#allocation5 + $0xe8] sm:$0xff]  ;;  %v1947_v60 = vpack.c.bf16 %v419_v54, %v417_v52  ;;  %v421_v1 = vld [vmem:[#allocation5 + $0xe0] sm:$0xff] }
  0x74   :  { %1928 = vmatpush1.bf16.msra.mxu1 %v1927_v62  ;;  %1898 = vmatprep.subr.bf16.mxu0 %v1897_v63  ;;  %v424_v58 = vld [vmem:[#allocation5 + $0xf8] sm:$0xff]  ;;  %v1917_v61 = vpack.c.bf16 %v179_v56, %v173_v55  ;;  %v172_v62 = vld [vmem:[#allocation7 + $0x2c0] sm:$0xff]  ;;  %v178_v63 = vld [vmem:[#allocation7 + $0x2f0] sm:$0xff] }
  0x75   :  { %1930 = vmatprep.subr.bf16.mxu1 %v1929_v4  ;;  %v1949_v2 = vpack.c.bf16 %v424_v58, %v422_v57  ;;  %v423_v3 = vld [vmem:[#allocation5 + $0xf0] sm:$0xff]  ;;  %v904_v4 = vld [vmem:[#allocation5 + $0x708] sm:$0xff]  ;;  %v906_v5 = vld [vmem:[#allocation5 + $0x718] sm:$0xff]  ;;  %v1919_v8 = vpack.c.bf16 %v178_v63, %v172_v62 }
  0x76   :  { %v426_v6 = vld [vmem:[#allocation5 + $0x108] sm:$0xff]  ;;  %v428_v7 = vld [vmem:[#allocation5 + $0x118] sm:$0xff]  ;;  %v1951_v9 = vpack.c.bf16 %v423_v3, %v421_v1  ;;  %v905_v13 = vld [vmem:[#allocation5 + $0x710] sm:$0xff] }
  0x77   :  { %1900 = vmatpush1.bf16.msra.mxu0 %v1899_v10  ;;  %v2113_v10 = vpack.c.bf16 %v906_v5, %v904_v4  ;;  %v1953_v14 = vpack.c.bf16 %v428_v7, %v426_v6  ;;  %v427_v15 = vld [vmem:[#allocation5 + $0x110] sm:$0xff]  ;;  %v910_v17 = vld [vmem:[#allocation5 + $0x738] sm:$0xff]  ;;  %v430_v18 = vld [vmem:[#allocation5 + $0x128] sm:$0xff] }
  0x78   :  { %1932 = vmatpush1.bf16.msra.mxu1 %v1931_v11  ;;  %1902 = vmatprep.subr.bf16.mxu0 %v1901_v12  ;;  %v425_v11 = vld [vmem:[#allocation5 + $0x100] sm:$0xff]  ;;  %v432_v19 = vld [vmem:[#allocation5 + $0x138] sm:$0xff]  ;;  %v909_v26 = vld [vmem:[#allocation5 + $0x730] sm:$0xff] }
  0x79   :  { %1934 = vmatprep.subr.bf16.mxu1 %v1933_v16  ;;  %v903_v12 = vld [vmem:[#allocation5 + $0x700] sm:$0xff]  ;;  %v908_v16 = vld [vmem:[#allocation5 + $0x728] sm:$0xff]  ;;  %v1957_v27 = vpack.c.bf16 %v432_v19, %v430_v18  ;;  %v914_v30 = vld [vmem:[#allocation5 + $0x758] sm:$0xff] }
  0x7a   :  { %v2115_v20 = vpack.c.bf16 %v905_v13, %v903_v12  ;;  %v72_v21 = vld [vmem:[#allocation2 + $0x8] sm:$0xff]  ;;  %v912_v29 = vld [vmem:[#allocation5 + $0x748] sm:$0xff]  ;;  %v436_v32 = vld [vmem:[#allocation5 + $0x158] sm:$0xff] }
  0x7b   :  { %1904 = vmatpush1.bf16.msra.mxu0 %v1903_v22  ;;  %v1955_v22 = vpack.c.bf16 %v427_v15, %v425_v11  ;;  %v907_v25 = vld [vmem:[#allocation5 + $0x720] sm:$0xff]  ;;  %657 = vmatprep.mubr.f32.mxu1 %v72_v21  ;;  %v434_v31 = vld [vmem:[#allocation5 + $0x148] sm:$0xff]  ;;  %v913_v38 = vld [vmem:[#allocation5 + $0x750] sm:$0xff] }
  0x7c   :  { %1936 = vmatpush1.bf16.msra.mxu1 %v1935_v23  ;;  %1906 = vmatprep.subr.bf16.mxu0 %v1905_v24  ;;  %v2117_v23 = vpack.c.bf16 %v910_v17, %v908_v16  ;;  %v429_v24 = vld [vmem:[#allocation5 + $0x120] sm:$0xff]  ;;  %v2119_v33 = vpack.c.bf16 %v909_v26, %v907_v25  ;;  %v1961_v39 = vpack.c.bf16 %v436_v32, %v434_v31  ;;  %v916_v41 = vld [vmem:[#allocation5 + $0x768] sm:$0xff]  ;;  %v918_v42 = vld [vmem:[#allocation5 + $0x778] sm:$0xff] }
  0x7d   :  { %1938 = vmatprep.subr.bf16.mxu1 %v1937_v28  ;;  %v431_v28 = vld [vmem:[#allocation5 + $0x130] sm:$0xff]  ;;  %v911_v37 = vld [vmem:[#allocation5 + $0x740] sm:$0xff]  ;;  %v438_v43 = vld [vmem:[#allocation5 + $0x168] sm:$0xff] }
  0x7e   :  { %v2123_v44 = vpack.c.bf16 %v913_v38, %v911_v37  ;;  %v917_v50 = vld [vmem:[#allocation5 + $0x770] sm:$0xff]  ;;  %v922_v54 = vld [vmem:[#allocation5 + $0x798] sm:$0xff]  ;;  %v442_v55 = vld [vmem:[#allocation5 + $0x188] sm:$0xff] }
  0x7f   :  { %1908 = vmatpush1.bf16.msra.mxu0 %v1907_v34  ;;  %v1959_v34 = vpack.c.bf16 %v431_v28, %v429_v24  ;;  %v439_v52 = vld [vmem:[#allocation5 + $0x170] sm:$0xff]  ;;  %v444_v56 = vld [vmem:[#allocation5 + $0x198] sm:$0xff]  ;;  %v446_v4 = vld [vmem:[#allocation5 + $0x1a8] sm:$0xff] }
  0x80   :  { %1940 = vmatpush1.bf16.msra.mxu1 %v1939_v35  ;;  %1910 = vmatprep.subr.bf16.mxu0 %v1909_v36  ;;  %v2121_v35 = vpack.c.bf16 %v914_v30, %v912_v29  ;;  %v433_v36 = vld [vmem:[#allocation5 + $0x140] sm:$0xff]  ;;  %v921_v62 = vld [vmem:[#allocation5 + $0x790] sm:$0xff]  ;;  %v1969_v63 = vpack.c.bf16 %v444_v56, %v442_v55  ;;  %v926_v3 = vld [vmem:[#allocation5 + $0x7b8] sm:$0xff] }
  0x81   :  { %1942 = vmatprep.subr.bf16.mxu1 %v1941_v40  ;;  %v435_v40 = vld [vmem:[#allocation5 + $0x150] sm:$0xff]  ;;  %v448_v5 = vld [vmem:[#allocation5 + $0x1b8] sm:$0xff]  ;;  %v450_v16 = vld [vmem:[#allocation5 + $0x1c8] sm:$0xff] }
  0x82   :  { %v1963_v45 = vpack.c.bf16 %v435_v40, %v433_v36  ;;  %v443_v1 = vld [vmem:[#allocation5 + $0x190] sm:$0xff]  ;;  %v1973_v12 = vpack.c.bf16 %v448_v5, %v446_v4  ;;  %v930_v15 = vld [vmem:[#allocation5 + $0x7d8] sm:$0xff]  ;;  %v449_v21 = vld [vmem:[#allocation5 + $0x1c0] sm:$0xff] }
  0x83   :  { %1912 = vmatpush1.bf16.msra.mxu0 %v1911_v46  ;;  %v2125_v46 = vpack.c.bf16 %v918_v42, %v916_v41  ;;  %v925_v11 = vld [vmem:[#allocation5 + $0x7b0] sm:$0xff]  ;;  %v452_v17 = vld [vmem:[#allocation5 + $0x1d8] sm:$0xff]  ;;  %v932_v26 = vld [vmem:[#allocation5 + $0x7e8] sm:$0xff] }
  0x84   :  { %1944 = vmatpush1.bf16.msra.mxu1 %v1943_v47  ;;  %1914 = vmatprep.subr.bf16.mxu0 %v1913_v49  ;;  %v437_v47 = vld [vmem:[#allocation5 + $0x160] sm:$0xff]  ;;  %v447_v13 = vld [vmem:[#allocation5 + $0x1b0] sm:$0xff]  ;;  %v1977_v24 = vpack.c.bf16 %v452_v17, %v450_v16  ;;  %v454_v28 = vld [vmem:[#allocation5 + $0x1e8] sm:$0xff] }
  0x85   :  { %1946 = vmatprep.subr.bf16.mxu1 %v1945_v53  ;;  %v915_v49 = vld [vmem:[#allocation5 + $0x760] sm:$0xff]  ;;  %v920_v53 = vld [vmem:[#allocation5 + $0x788] sm:$0xff]  ;;  %v1967_v58 = vpack.c.bf16 %v439_v52, %v437_v47  ;;  %v451_v25 = vld [vmem:[#allocation5 + $0x1d0] sm:$0xff] }
  0x86   :  { %v2127_v57 = vpack.c.bf16 %v917_v50, %v915_v49  ;;  %v456_v29 = vld [vmem:[#allocation5 + $0x1f8] sm:$0xff]  ;;  %v1979_v31 = vpack.c.bf16 %v451_v25, %v449_v21  ;;  %v455_v37 = vld [vmem:[#allocation5 + $0x1f0] sm:$0xff]  ;;  %v872_v38 = vld [vmem:[#allocation5 + $0x608] sm:$0xff] }
  0x87   :  { %1916 = vmatpush1.bf16.msra.mxu0 %v1915_v59  ;;  %v2129_v59 = vpack.c.bf16 %v922_v54, %v920_v53  ;;  %v1981_v36 = vpack.c.bf16 %v456_v29, %v454_v28  ;;  %v458_v40 = vld [vmem:[#allocation5 + $0x208] sm:$0xff]  ;;  %v460_v41 = vld [vmem:[#allocation5 + $0x218] sm:$0xff]  ;;  %v459_v49 = vld [vmem:[#allocation5 + $0x210] sm:$0xff] }
  0x88   :  { %1948 = vmatpush1.bf16.msra.mxu1 %v1947_v60  ;;  %1918 = vmatprep.subr.bf16.mxu0 %v1917_v61  ;;  %v441_v60 = vld [vmem:[#allocation5 + $0x180] sm:$0xff]  ;;  %v1985_v47 = vpack.c.bf16 %v460_v41, %v458_v40  ;;  %v876_v50 = vld [vmem:[#allocation5 + $0x628] sm:$0xff]  ;;  %v464_v53 = vld [vmem:[#allocation5 + $0x238] sm:$0xff] }
  0x89   :  { %1950 = vmatprep.subr.bf16.mxu1 %v1949_v2  ;;  %v919_v61 = vld [vmem:[#allocation5 + $0x780] sm:$0xff]  ;;  %v924_v2 = vld [vmem:[#allocation5 + $0x7a8] sm:$0xff]  ;;  %v1971_v7 = vpack.c.bf16 %v443_v1, %v441_v60  ;;  %v71_v54 = vld [vmem:[#allocation2] sm:$0xff] }
  0x8a   :  { %v2131_v6 = vpack.c.bf16 %v921_v62, %v919_v61  ;;  %v462_v52 = vld [vmem:[#allocation5 + $0x228] sm:$0xff]  ;;  %v78_v55 = vld [vmem:[#allocation2 + $0x38] sm:$0xff]  ;;  %v875_v60 = vld [vmem:[#allocation5 + $0x620] sm:$0xff] }
  0x8b   :  { %1920 = vmatpush1.bf16.msra.mxu0 %v1919_v8  ;;  %v2133_v8 = vpack.c.bf16 %v926_v3, %v924_v2  ;;  %v877_v61 = vld [vmem:[#allocation5 + $0x630] sm:$0xff]  ;;  %v1989_v62 = vpack.c.bf16 %v464_v53, %v462_v52  ;;  %v880_v1 = vld [vmem:[#allocation5 + $0x648] sm:$0xff]  ;;  %v882_v2 = vld [vmem:[#allocation5 + $0x658] sm:$0xff] }
  0x8c   :  { %1952 = vmatpush1.bf16.msra.mxu1 %v1951_v9  ;;  %2114 = vmatprep.subr.bf16.mxu0 %v2113_v10  ;;  %v445_v9 = vld [vmem:[#allocation5 + $0x1a0] sm:$0xff]  ;;  %v466_v3 = vld [vmem:[#allocation5 + $0x248] sm:$0xff]  ;;  %v468_v4 = vld [vmem:[#allocation5 + $0x258] sm:$0xff]  ;;  %v2151_v5 = vpack.c.bf16 %v877_v61, %v875_v60 }
  0x8d   :  { %1954 = vmatprep.subr.bf16.mxu1 %v1953_v14  ;;  %v923_v10 = vld [vmem:[#allocation5 + $0x7a0] sm:$0xff]  ;;  %v928_v14 = vld [vmem:[#allocation5 + $0x7c8] sm:$0xff]  ;;  %v1975_v19 = vpack.c.bf16 %v447_v13, %v445_v9  ;;  %v467_v13 = vld [vmem:[#allocation5 + $0x250] sm:$0xff] }
  0x8e   :  { %387 = vmatmul.mubr.f32.vlgmr.msra.gmra.mrb[2].mxu0 %v2640_v48  ;;  %v440_v48 = vld [vmem:[#allocation5 + $0x178] sm:$0xff]  ;;  %v2135_v18 = vpack.c.bf16 %v925_v11, %v923_v10  ;;  %v465_v9 = vld [vmem:[#allocation5 + $0x240] sm:$0xff]  ;;  %v881_v11 = vld [vmem:[#allocation5 + $0x650] sm:$0xff] }
  0x8f   :  { %2116 = vmatpush1.bf16.msra.mxu0 %v2115_v20  ;;  %999 = vmatprep.mubr.f32.mxu0 %v2557_v0  ;;  %v1965_v51 = vpack.c.bf16 %v440_v48, %v438_v43  ;;  %v2137_v20 = vpack.c.bf16 %v930_v15, %v928_v14  ;;  %v879_v10 = vld [vmem:[#allocation5 + $0x640] sm:$0xff]  ;;  %v884_v14 = vld [vmem:[#allocation5 + $0x668] sm:$0xff]  ;;  %v886_v15 = vld [vmem:[#allocation5 + $0x678] sm:$0xff] }
  0x90   :  { %1956 = vmatpush1.bf16.msra.mxu1 %v1955_v22  ;;  %2118 = vmatprep.subr.bf16.mxu0 %v2117_v23  ;;  %v927_v22 = vld [vmem:[#allocation5 + $0x7c0] sm:$0xff]  ;;  %v929_v23 = vld [vmem:[#allocation5 + $0x7d0] sm:$0xff]  ;;  %v470_v16 = vld [vmem:[#allocation5 + $0x268] sm:$0xff] }
  0x91   :  { %1958 = vmatprep.subr.bf16.mxu1 %v1957_v27  ;;  %v934_v27 = vld [vmem:[#allocation5 + $0x7f8] sm:$0xff]  ;;  %v2139_v30 = vpack.c.bf16 %v929_v23, %v927_v22  ;;  %v469_v21 = vld [vmem:[#allocation5 + $0x260] sm:$0xff]  ;;  %v885_v23 = vld [vmem:[#allocation5 + $0x670] sm:$0xff] }
  0x92   :  { %v2141_v32 = vpack.c.bf16 %v934_v27, %v932_v26  ;;  %v472_v17 = vld [vmem:[#allocation5 + $0x278] sm:$0xff]  ;;  %v883_v22 = vld [vmem:[#allocation5 + $0x660] sm:$0xff]  ;;  %v471_v25 = vld [vmem:[#allocation5 + $0x270] sm:$0xff] }
  0x93   :  { %2120 = vmatpush1.bf16.msra.mxu0 %v2119_v33  ;;  %v453_v33 = vld [vmem:[#allocation5 + $0x1e0] sm:$0xff]  ;;  %v888_v26 = vld [vmem:[#allocation5 + $0x688] sm:$0xff]  ;;  %v890_v27 = vld [vmem:[#allocation5 + $0x698] sm:$0xff] }
  0x94   :  { %1960 = vmatpush1.bf16.msra.mxu1 %v1959_v34  ;;  %2122 = vmatprep.subr.bf16.mxu0 %v2121_v35  ;;  %v931_v34 = vld [vmem:[#allocation5 + $0x7e0] sm:$0xff]  ;;  %v933_v35 = vld [vmem:[#allocation5 + $0x7f0] sm:$0xff]  ;;  %v1983_v43 = vpack.c.bf16 %v455_v37, %v453_v33  ;;  %v474_v28 = vld [vmem:[#allocation5 + $0x288] sm:$0xff] }
  0x95   :  { %1962 = vmatprep.subr.bf16.mxu1 %v1961_v39  ;;  %v874_v39 = vld [vmem:[#allocation5 + $0x618] sm:$0xff]  ;;  %v2143_v42 = vpack.c.bf16 %v933_v35, %v931_v34  ;;  %v887_v33 = vld [vmem:[#allocation5 + $0x680] sm:$0xff]  ;;  %v889_v34 = vld [vmem:[#allocation5 + $0x690] sm:$0xff] }
  0x96   :  { %v2145_v48 = vpack.c.bf16 %v874_v39, %v872_v38  ;;  %v476_v29 = vld [vmem:[#allocation5 + $0x298] sm:$0xff]  ;;  %v892_v37 = vld [vmem:[#allocation5 + $0x6a8] sm:$0xff]  ;;  %v2163_v41 = vpack.c.bf16 %v889_v34, %v887_v33  ;;  %v483_v60 = vld [vmem:[#allocation5 + $0x2d0] sm:$0xff] }
  0x97   :  { %2124 = vmatpush1.bf16.msra.mxu0 %v2123_v44  ;;  %v457_v44 = vld [vmem:[#allocation5 + $0x200] sm:$0xff]  ;;  %v2001_v35 = vpack.c.bf16 %v476_v29, %v474_v28  ;;  %v894_v38 = vld [vmem:[#allocation5 + $0x6b8] sm:$0xff]  ;;  %v478_v39 = vld [vmem:[#allocation5 + $0x2a8] sm:$0xff] }
  0x98   :  { %1964 = vmatpush1.bf16.msra.mxu1 %v1963_v45  ;;  %2126 = vmatprep.subr.bf16.mxu0 %v2125_v46  ;;  %v871_v45 = vld [vmem:[#allocation5 + $0x600] sm:$0xff]  ;;  %v873_v46 = vld [vmem:[#allocation5 + $0x610] sm:$0xff]  ;;  %v480_v40 = vld [vmem:[#allocation5 + $0x2b8] sm:$0xff] }
  0x99   :  { %1966 = vmatprep.subr.bf16.mxu1 %v1965_v51  ;;  %v878_v51 = vld [vmem:[#allocation5 + $0x638] sm:$0xff]  ;;  %v2147_v56 = vpack.c.bf16 %v873_v46, %v871_v45  ;;  %v893_v45 = vld [vmem:[#allocation5 + $0x6b0] sm:$0xff]  ;;  %v2005_v46 = vpack.c.bf16 %v480_v40, %v478_v39  ;;  %v900_v61 = vld [vmem:[#allocation5 + $0x6e8] sm:$0xff] }
  0x9a   :  { %v484_v52 = vld [vmem:[#allocation5 + $0x2d8] sm:$0xff]  ;;  %v497_v28 = vld [vmem:[#allocation5 + $0x340] sm:$0xff]  ;;  %v499_v29 = vld [vmem:[#allocation5 + $0x350] sm:$0xff] }
  0x9b   :  { %2128 = vmatpush1.bf16.msra.mxu0 %v2127_v57  ;;  %v1987_v57 = vpack.c.bf16 %v459_v49, %v457_v44  ;;  %v891_v44 = vld [vmem:[#allocation5 + $0x6a0] sm:$0xff]  ;;  %v896_v49 = vld [vmem:[#allocation5 + $0x6c8] sm:$0xff]  ;;  %v503_v34 = vld [vmem:[#allocation5 + $0x370] sm:$0xff] }
  0x9c   :  { %1968 = vmatpush1.bf16.msra.mxu1 %v1967_v58  ;;  %2130 = vmatprep.subr.bf16.mxu0 %v2129_v59  ;;  %v2149_v58 = vpack.c.bf16 %v878_v51, %v876_v50  ;;  %v461_v59 = vld [vmem:[#allocation5 + $0x220] sm:$0xff]  ;;  %v898_v50 = vld [vmem:[#allocation5 + $0x6d8] sm:$0xff]  ;;  %v482_v51 = vld [vmem:[#allocation5 + $0x2c8] sm:$0xff]  ;;  %v2167_v53 = vpack.c.bf16 %v893_v45, %v891_v44 }
  0x9d   :  { %1970 = vmatprep.subr.bf16.mxu1 %v1969_v63  ;;  %v463_v63 = vld [vmem:[#allocation5 + $0x230] sm:$0xff]  ;;  %v501_v33 = vld [vmem:[#allocation5 + $0x360] sm:$0xff] }
  0x9e   :  { %v505_v39 = vld [vmem:[#allocation5 + $0x380] sm:$0xff]  ;;  %v507_v40 = vld [vmem:[#allocation5 + $0x390] sm:$0xff] }
  0x9f   :  { %2132 = vmatpush1.bf16.msra.mxu0 %v2131_v6  ;;  %v74_v6 = vld [vmem:[#allocation2 + $0x18] sm:$0xff]  ;;  %v509_v44 = vld [vmem:[#allocation5 + $0x3a0] sm:$0xff] }
  0xa0   :  { %1972 = vmatpush1.bf16.msra.mxu1 %v1971_v7  ;;  %2134 = vmatprep.subr.bf16.mxu0 %v2133_v8  ;;  %v1991_v7 = vpack.c.bf16 %v463_v63, %v461_v59  ;;  %v2153_v8 = vpack.c.bf16 %v882_v2, %v880_v1  ;;  %v2009_v59 = vpack.c.bf16 %v484_v52, %v482_v51  ;;  %v486_v63 = vld [vmem:[#allocation5 + $0x2e8] sm:$0xff]  ;;  %v488_v1 = vld [vmem:[#allocation5 + $0x2f8] sm:$0xff]  ;;  %v511_v45 = vld [vmem:[#allocation5 + $0x3b0] sm:$0xff] }
  0xa1   :  { %1974 = vmatprep.subr.bf16.mxu1 %v1973_v12  ;;  %v1993_v12 = vpack.c.bf16 %v468_v4, %v466_v3  ;;  %v513_v51 = vld [vmem:[#allocation5 + $0x3c0] sm:$0xff]  ;;  %v515_v52 = vld [vmem:[#allocation5 + $0x3d0] sm:$0xff] }
  0xa3   :  { %2136 = vmatpush1.bf16.msra.mxu0 %v2135_v18  ;;  %v2155_v18 = vpack.c.bf16 %v881_v11, %v879_v10  ;;  %v490_v10 = vld [vmem:[#allocation5 + $0x308] sm:$0xff]  ;;  %v492_v11 = vld [vmem:[#allocation5 + $0x318] sm:$0xff] }
  0xa4   :  { %1976 = vmatpush1.bf16.msra.mxu1 %v1975_v19  ;;  %2138 = vmatprep.subr.bf16.mxu0 %v2137_v20  ;;  %v1995_v19 = vpack.c.bf16 %v467_v13, %v465_v9  ;;  %v2157_v20 = vpack.c.bf16 %v886_v15, %v884_v14  ;;  %v487_v9 = vld [vmem:[#allocation5 + $0x2f0] sm:$0xff]  ;;  %v2017_v14 = vpack.c.bf16 %v492_v11, %v490_v10  ;;  %v489_v15 = vld [vmem:[#allocation5 + $0x300] sm:$0xff]  ;;  %v530_v10 = vld [vmem:[#allocation5 + $0x448] sm:$0xff] }
  0xa5   :  { %1978 = vmatprep.subr.bf16.mxu1 %v1977_v24  ;;  %v1997_v24 = vpack.c.bf16 %v472_v17, %v470_v16  ;;  %v491_v16 = vld [vmem:[#allocation5 + $0x310] sm:$0xff]  ;;  %v494_v17 = vld [vmem:[#allocation5 + $0x328] sm:$0xff]  ;;  %v532_v11 = vld [vmem:[#allocation5 + $0x458] sm:$0xff] }
  0xa7   :  { %2140 = vmatpush1.bf16.msra.mxu0 %v2139_v30  ;;  %v1999_v30 = vpack.c.bf16 %v471_v25, %v469_v21  ;;  %v500_v25 = vld [vmem:[#allocation5 + $0x358] sm:$0xff] }
  0xa8   :  { %1980 = vmatpush1.bf16.msra.mxu1 %v1979_v31  ;;  %2142 = vmatprep.subr.bf16.mxu0 %v2141_v32  ;;  %v2161_v31 = vpack.c.bf16 %v890_v27, %v888_v26  ;;  %v473_v32 = vld [vmem:[#allocation5 + $0x280] sm:$0xff] }
  0xa9   :  { %1982 = vmatprep.subr.bf16.mxu1 %v1981_v36  ;;  %v475_v36 = vld [vmem:[#allocation5 + $0x290] sm:$0xff] }
  0xab   :  { %2144 = vmatpush1.bf16.msra.mxu0 %v2143_v42  ;;  %v2003_v42 = vpack.c.bf16 %v475_v36, %v473_v32  ;;  %v508_v36 = vld [vmem:[#allocation5 + $0x398] sm:$0xff] }
  0xac   :  { %1984 = vmatpush1.bf16.msra.mxu1 %v1983_v43  ;;  %2146 = vmatprep.subr.bf16.mxu0 %v2145_v48  ;;  %v2165_v43 = vpack.c.bf16 %v894_v38, %v892_v37  ;;  %v477_v48 = vld [vmem:[#allocation5 + $0x2a0] sm:$0xff]  ;;  %v2031_v37 = vpack.c.bf16 %v503_v34, %v501_v33  ;;  %v546_v33 = vld [vmem:[#allocation5 + $0x4c8] sm:$0xff]  ;;  %v548_v34 = vld [vmem:[#allocation5 + $0x4d8] sm:$0xff] }
  0xad   :  { %1986 = vmatprep.subr.bf16.mxu1 %v1985_v47  ;;  %v479_v47 = vld [vmem:[#allocation5 + $0x2b0] sm:$0xff] }
  0xae   :  { %1000 = vmatmul.mubr.f32.vlgmr.msra.gmra.mrb[4].mxu0 %v78_v55  ;;  %v2169_v55 = vpack.c.bf16 %v898_v50, %v896_v49  ;;  %v2039_v49 = vpack.c.bf16 %v511_v45, %v509_v44  ;;  %v554_v44 = vld [vmem:[#allocation5 + $0x508] sm:$0xff]  ;;  %v556_v45 = vld [vmem:[#allocation5 + $0x518] sm:$0xff] }
  0xaf   :  { %658 = vmatmul.mubr.f32.vlgmr.msra.gmra.mrb[2].mxu1 %v71_v54  ;;  %2148 = vmatpush1.bf16.msra.mxu0 %v2147_v56  ;;  %v2007_v54 = vpack.c.bf16 %v479_v47, %v477_v48  ;;  %v481_v56 = vld [vmem:[#allocation5 + $0x2c0] sm:$0xff]  ;;  %v516_v47 = vld [vmem:[#allocation5 + $0x3d8] sm:$0xff] }
  0xb0   :  { %1988 = vmatpush1.bf16.msra.mxu1 %v1987_v57  ;;  %2150 = vmatprep.subr.bf16.mxu0 %v2149_v58  ;;  %v895_v57 = vld [vmem:[#allocation5 + $0x6c0] sm:$0xff]  ;;  %v897_v58 = vld [vmem:[#allocation5 + $0x6d0] sm:$0xff]  ;;  %v2011_v3 = vpack.c.bf16 %v483_v60, %v481_v56  ;;  %v524_v60 = vld [vmem:[#allocation5 + $0x418] sm:$0xff] }
  0xb1   :  { %1990 = vmatprep.subr.bf16.mxu1 %v1989_v62  ;;  %1070 = vmatprep.mubr.f32.mxu0 %v2557_v0  ;;  %v2159_v0 = vpack.c.bf16 %v885_v23, %v883_v22  ;;  %v902_v62 = vld [vmem:[#allocation5 + $0x6f8] sm:$0xff]  ;;  %v2171_v2 = vpack.c.bf16 %v897_v58, %v895_v57  ;;  %v493_v22 = vld [vmem:[#allocation5 + $0x320] sm:$0xff]  ;;  %v495_v23 = vld [vmem:[#allocation5 + $0x330] sm:$0xff] }
  0xb2   :  { %728 = vmatprep.mubr.f32.mxu1 %v74_v6  ;;  %v2173_v4 = vpack.c.bf16 %v902_v62, %v900_v61  ;;  %v901_v6 = vld [vmem:[#allocation5 + $0x6f0] sm:$0xff]  ;;  %v2023_v26 = vpack.c.bf16 %v495_v23, %v493_v22  ;;  %v517_v57 = vld [vmem:[#allocation5 + $0x3e0] sm:$0xff]  ;;  %v538_v22 = vld [vmem:[#allocation5 + $0x488] sm:$0xff] }
  0xb3   :  { %2152 = vmatpush1.bf16.msra.mxu0 %v2151_v5  ;;  %v899_v5 = vld [vmem:[#allocation5 + $0x6e0] sm:$0xff]  ;;  %v519_v58 = vld [vmem:[#allocation5 + $0x3f0] sm:$0xff]  ;;  %v540_v23 = vld [vmem:[#allocation5 + $0x498] sm:$0xff] }
  0xb4   :  { %1992 = vmatpush1.bf16.msra.mxu1 %v1991_v7  ;;  %2154 = vmatprep.subr.bf16.mxu0 %v2153_v8  ;;  %v2013_v7 = vpack.c.bf16 %v488_v1, %v486_v63  ;;  %v485_v8 = vld [vmem:[#allocation5 + $0x2e0] sm:$0xff]  ;;  %v2047_v61 = vpack.c.bf16 %v519_v58, %v517_v57  ;;  %v523_v1 = vld [vmem:[#allocation5 + $0x410] sm:$0xff]  ;;  %v562_v57 = vld [vmem:[#allocation5 + $0x548] sm:$0xff] }
  0xb5   :  { %1994 = vmatprep.subr.bf16.mxu1 %v1993_v12  ;;  %v2175_v12 = vpack.c.bf16 %v901_v6, %v899_v5  ;;  %v2015_v13 = vpack.c.bf16 %v487_v9, %v485_v8  ;;  %v521_v63 = vld [vmem:[#allocation5 + $0x400] sm:$0xff]  ;;  %v527_v8 = vld [vmem:[#allocation5 + $0x430] sm:$0xff]  ;;  %v564_v58 = vld [vmem:[#allocation5 + $0x558] sm:$0xff] }
  0xb6   :  { %v2051_v5 = vpack.c.bf16 %v523_v1, %v521_v63  ;;  %v76_v9 = vld [vmem:[#allocation2 + $0x28] sm:$0xff]  ;;  %v566_v63 = vld [vmem:[#allocation5 + $0x568] sm:$0xff]  ;;  %v568_v1 = vld [vmem:[#allocation5 + $0x578] sm:$0xff] }
  0xb7   :  { %2156 = vmatpush1.bf16.msra.mxu0 %v2155_v18  ;;  %v496_v18 = vld [vmem:[#allocation5 + $0x338] sm:$0xff] }
  0xb8   :  { %1996 = vmatpush1.bf16.msra.mxu1 %v1995_v19  ;;  %2158 = vmatprep.subr.bf16.mxu0 %v2157_v20  ;;  %v77_v19 = vld [vmem:[#allocation2 + $0x30] sm:$0xff]  ;;  %v2019_v20 = vpack.c.bf16 %v491_v16, %v489_v15  ;;  %v2021_v21 = vpack.c.bf16 %v496_v18, %v494_v17  ;;  %v531_v15 = vld [vmem:[#allocation5 + $0x450] sm:$0xff]  ;;  %v536_v17 = vld [vmem:[#allocation5 + $0x478] sm:$0xff] }
  0xb9   :  { %1998 = vmatprep.subr.bf16.mxu1 %v1997_v24  ;;  %v498_v24 = vld [vmem:[#allocation5 + $0x348] sm:$0xff] }
  0xba   :  { %v2025_v27 = vpack.c.bf16 %v500_v25, %v498_v24  ;;  %v534_v16 = vld [vmem:[#allocation5 + $0x468] sm:$0xff]  ;;  %v2065_v25 = vpack.c.bf16 %v540_v23, %v538_v22  ;;  %v577_v22 = vld [vmem:[#allocation5 + $0x5c0] sm:$0xff]  ;;  %v579_v23 = vld [vmem:[#allocation5 + $0x5d0] sm:$0xff] }
  0xbb   :  { %2160 = vmatpush1.bf16.msra.mxu0 %v2159_v0  ;;  %v502_v0 = vld [vmem:[#allocation5 + $0x368] sm:$0xff] }
  0xbc   :  { %2000 = vmatpush1.bf16.msra.mxu1 %v1999_v30  ;;  %2162 = vmatprep.subr.bf16.mxu0 %v2161_v31  ;;  %v504_v30 = vld [vmem:[#allocation5 + $0x378] sm:$0xff]  ;;  %v2027_v31 = vpack.c.bf16 %v499_v29, %v497_v28  ;;  %v542_v28 = vld [vmem:[#allocation5 + $0x4a8] sm:$0xff] }
  0xbd   :  { %2002 = vmatprep.subr.bf16.mxu1 %v2001_v35  ;;  %v2029_v32 = vpack.c.bf16 %v504_v30, %v502_v0  ;;  %v506_v35 = vld [vmem:[#allocation5 + $0x388] sm:$0xff]  ;;  %v544_v29 = vld [vmem:[#allocation5 + $0x4b8] sm:$0xff] }
  0xbe   :  { %v2033_v38 = vpack.c.bf16 %v508_v36, %v506_v35  ;;  %v2069_v30 = vpack.c.bf16 %v544_v29, %v542_v28  ;;  %v2073_v36 = vpack.c.bf16 %v548_v34, %v546_v33  ;;  %v581_v28 = vld [vmem:[#allocation5 + $0x5e0] sm:$0xff]  ;;  %v583_v29 = vld [vmem:[#allocation5 + $0x5f0] sm:$0xff] }
  0xbf   :  { %2164 = vmatpush1.bf16.msra.mxu0 %v2163_v41  ;;  %v510_v41 = vld [vmem:[#allocation5 + $0x3a8] sm:$0xff] }
  0xc0   :  { %2004 = vmatpush1.bf16.msra.mxu1 %v2003_v42  ;;  %2166 = vmatprep.subr.bf16.mxu0 %v2165_v43  ;;  %v512_v42 = vld [vmem:[#allocation5 + $0x3b8] sm:$0xff]  ;;  %v2035_v43 = vpack.c.bf16 %v507_v40, %v505_v39  ;;  %v550_v39 = vld [vmem:[#allocation5 + $0x4e8] sm:$0xff] }
  0xc1   :  { %2006 = vmatprep.subr.bf16.mxu1 %v2005_v46  ;;  %v2037_v48 = vpack.c.bf16 %v512_v42, %v510_v41  ;;  %v514_v46 = vld [vmem:[#allocation5 + $0x3c8] sm:$0xff]  ;;  %v552_v40 = vld [vmem:[#allocation5 + $0x4f8] sm:$0xff] }
  0xc2   :  { %v2041_v50 = vpack.c.bf16 %v516_v47, %v514_v46  ;;  %v2077_v42 = vpack.c.bf16 %v552_v40, %v550_v39  ;;  %v2081_v47 = vpack.c.bf16 %v556_v45, %v554_v44  ;;  %v1187_v39 = vld [vmem:[#allocation5 + $0x810] sm:$0xff]  ;;  %v1190_v40 = vld [vmem:[#allocation5 + $0x828] sm:$0xff] }
  0xc3   :  { %2168 = vmatpush1.bf16.msra.mxu0 %v2167_v53  ;;  %v518_v53 = vld [vmem:[#allocation5 + $0x3e8] sm:$0xff]  ;;  %v1191_v44 = vld [vmem:[#allocation5 + $0x830] sm:$0xff] }
  0xc4   :  { %2008 = vmatpush1.bf16.msra.mxu1 %v2007_v54  ;;  %2170 = vmatprep.subr.bf16.mxu0 %v2169_v55  ;;  %v520_v54 = vld [vmem:[#allocation5 + $0x3f8] sm:$0xff]  ;;  %v2043_v55 = vpack.c.bf16 %v515_v52, %v513_v51  ;;  %v558_v51 = vld [vmem:[#allocation5 + $0x528] sm:$0xff] }
  0xc5   :  { %2010 = vmatprep.subr.bf16.mxu1 %v2009_v59  ;;  %v2045_v56 = vpack.c.bf16 %v520_v54, %v518_v53  ;;  %v522_v59 = vld [vmem:[#allocation5 + $0x408] sm:$0xff]  ;;  %v560_v52 = vld [vmem:[#allocation5 + $0x538] sm:$0xff] }
  0xc6   :  { %v2049_v62 = vpack.c.bf16 %v524_v60, %v522_v59  ;;  %v2085_v54 = vpack.c.bf16 %v560_v52, %v558_v51  ;;  %v2089_v60 = vpack.c.bf16 %v564_v58, %v562_v57  ;;  %v1194_v45 = vld [vmem:[#allocation5 + $0x848] sm:$0xff]  ;;  %v1195_v51 = vld [vmem:[#allocation5 + $0x850] sm:$0xff] }
  0xc7   :  { %2172 = vmatpush1.bf16.msra.mxu0 %v2171_v2  ;;  %v526_v2 = vld [vmem:[#allocation5 + $0x428] sm:$0xff]  ;;  %v1199_v57 = vld [vmem:[#allocation5 + $0x870] sm:$0xff] }
  0xc8   :  { %2012 = vmatpush1.bf16.msra.mxu1 %v2011_v3  ;;  %2174 = vmatprep.subr.bf16.mxu0 %v2173_v4  ;;  %v528_v3 = vld [vmem:[#allocation5 + $0x438] sm:$0xff]  ;;  %v73_v4 = vld [vmem:[#allocation2 + $0x10] sm:$0xff] }
  0xc9   :  { %2014 = vmatprep.subr.bf16.mxu1 %v2013_v7  ;;  %v2053_v6 = vpack.c.bf16 %v528_v3, %v526_v2  ;;  %v525_v7 = vld [vmem:[#allocation5 + $0x420] sm:$0xff]  ;;  %v2093_v3 = vpack.c.bf16 %v568_v1, %v566_v63  ;;  %v1198_v52 = vld [vmem:[#allocation5 + $0x868] sm:$0xff]  ;;  %v1203_v63 = vld [vmem:[#allocation5 + $0x890] sm:$0xff] }
  0xca   :  { %v1202_v58 = vld [vmem:[#allocation5 + $0x888] sm:$0xff] }
  0xcb   :  { %2176 = vmatpush1.bf16.msra.mxu0 %v2175_v12  ;;  %v2055_v12 = vpack.c.bf16 %v527_v8, %v525_v7  ;;  %v572_v7 = vld [vmem:[#allocation5 + $0x598] sm:$0xff] }
  0xcc   :  { %2016 = vmatpush1.bf16.msra.mxu1 %v2015_v13  ;;  %v2057_v13 = vpack.c.bf16 %v532_v11, %v530_v10  ;;  %v569_v10 = vld [vmem:[#allocation5 + $0x580] sm:$0xff]  ;;  %v571_v11 = vld [vmem:[#allocation5 + $0x590] sm:$0xff] }
  0xcd   :  { %2018 = vmatprep.subr.bf16.mxu1 %v2017_v14  ;;  %v529_v14 = vld [vmem:[#allocation5 + $0x440] sm:$0xff] }
  0xce   :  { %1071 = vmatmul.mubr.f32.vlgmr.msra.gmra.mrb[4].mxu0 %v77_v19  ;;  %v2059_v18 = vpack.c.bf16 %v531_v15, %v529_v14  ;;  %v2061_v19 = vpack.c.bf16 %v536_v17, %v534_v16  ;;  %v2099_v14 = vpack.c.bf16 %v571_v11, %v569_v10  ;;  %v573_v16 = vld [vmem:[#allocation5 + $0x5a0] sm:$0xff]  ;;  %v575_v17 = vld [vmem:[#allocation5 + $0x5b0] sm:$0xff]  ;;  %v1210_v10 = vld [vmem:[#allocation5 + $0x8c8] sm:$0xff] }
  0xcf   :  { %v1212_v11 = vld [vmem:[#allocation5 + $0x8d8] sm:$0xff] }
  0xd0   :  { %2020 = vmatpush1.bf16.msra.mxu1 %v2019_v20  ;;  %v533_v20 = vld [vmem:[#allocation5 + $0x460] sm:$0xff] }
  0xd1   :  { %2022 = vmatprep.subr.bf16.mxu1 %v2021_v21  ;;  %v535_v21 = vld [vmem:[#allocation5 + $0x470] sm:$0xff] }
  0xd2   :  { %v2063_v24 = vpack.c.bf16 %v535_v21, %v533_v20  ;;  %v2103_v20 = vpack.c.bf16 %v575_v17, %v573_v16  ;;  %v1214_v16 = vld [vmem:[#allocation5 + $0x8e8] sm:$0xff]  ;;  %v1216_v17 = vld [vmem:[#allocation5 + $0x8f8] sm:$0xff] }
  0xd4   :  { %2024 = vmatpush1.bf16.msra.mxu1 %v2023_v26  ;;  %v537_v26 = vld [vmem:[#allocation5 + $0x480] sm:$0xff] }
  0xd5   :  { %2026 = vmatprep.subr.bf16.mxu1 %v2025_v27  ;;  %v539_v27 = vld [vmem:[#allocation5 + $0x490] sm:$0xff] }
  0xd6   :  { %v2067_v0 = vpack.c.bf16 %v539_v27, %v537_v26  ;;  %v2107_v26 = vpack.c.bf16 %v579_v23, %v577_v22  ;;  %v1218_v22 = vld [vmem:[#allocation5 + $0x908] sm:$0xff]  ;;  %v1220_v23 = vld [vmem:[#allocation5 + $0x918] sm:$0xff] }
  0xd8   :  { %2028 = vmatpush1.bf16.msra.mxu1 %v2027_v31  ;;  %v541_v31 = vld [vmem:[#allocation5 + $0x4a0] sm:$0xff] }
  0xd9   :  { %2030 = vmatprep.subr.bf16.mxu1 %v2029_v32  ;;  %v543_v32 = vld [vmem:[#allocation5 + $0x4b0] sm:$0xff] }
  0xda   :  { %v2071_v35 = vpack.c.bf16 %v543_v32, %v541_v31 }
  0xdc   :  { %2032 = vmatpush1.bf16.msra.mxu1 %v2031_v37  ;;  %v545_v37 = vld [vmem:[#allocation5 + $0x4c0] sm:$0xff] }
  0xdd   :  { %2034 = vmatprep.subr.bf16.mxu1 %v2033_v38  ;;  %v547_v38 = vld [vmem:[#allocation5 + $0x4d0] sm:$0xff] }
  0xde   :  { %v2075_v41 = vpack.c.bf16 %v547_v38, %v545_v37  ;;  %v1185_v37 = vld [vmem:[#allocation5 + $0x800] sm:$0xff] }
  0xe0   :  { %2036 = vmatpush1.bf16.msra.mxu1 %v2035_v43  ;;  %v549_v43 = vld [vmem:[#allocation5 + $0x4e0] sm:$0xff] }
  0xe1   :  { %2038 = vmatprep.subr.bf16.mxu1 %v2037_v48  ;;  %v551_v48 = vld [vmem:[#allocation5 + $0x4f0] sm:$0xff] }
  0xe2   :  { %v2079_v46 = vpack.c.bf16 %v551_v48, %v549_v43  ;;  %v1189_v48 = vld [vmem:[#allocation5 + $0x820] sm:$0xff] }
  0xe4   :  { %2040 = vmatpush1.bf16.msra.mxu1 %v2039_v49  ;;  %v553_v49 = vld [vmem:[#allocation5 + $0x500] sm:$0xff] }
  0xe5   :  { %2042 = vmatprep.subr.bf16.mxu1 %v2041_v50  ;;  %v555_v50 = vld [vmem:[#allocation5 + $0x510] sm:$0xff] }
  0xe6   :  { %v2083_v53 = vpack.c.bf16 %v555_v50, %v553_v49  ;;  %v1193_v50 = vld [vmem:[#allocation5 + $0x840] sm:$0xff] }
  0xe8   :  { %2044 = vmatpush1.bf16.msra.mxu1 %v2043_v55  ;;  %v557_v55 = vld [vmem:[#allocation5 + $0x520] sm:$0xff] }
  0xe9   :  { %2046 = vmatprep.subr.bf16.mxu1 %v2045_v56  ;;  %v559_v56 = vld [vmem:[#allocation5 + $0x530] sm:$0xff] }
  0xea   :  { %v2087_v59 = vpack.c.bf16 %v559_v56, %v557_v55  ;;  %v1197_v56 = vld [vmem:[#allocation5 + $0x860] sm:$0xff] }
  0xec   :  { %2048 = vmatpush1.bf16.msra.mxu1 %v2047_v61  ;;  %v561_v61 = vld [vmem:[#allocation5 + $0x540] sm:$0xff] }
  0xed   :  { %2050 = vmatprep.subr.bf16.mxu1 %v2049_v62  ;;  %v563_v62 = vld [vmem:[#allocation5 + $0x550] sm:$0xff] }
  0xee   :  { %v2091_v2 = vpack.c.bf16 %v563_v62, %v561_v61  ;;  %v1201_v62 = vld [vmem:[#allocation5 + $0x880] sm:$0xff] }
  0xef   :  { %729 = vmatmul.mubr.f32.vlgmr.msra.gmra.mrb[2].mxu1 %v73_v4  ;;  %v565_v4 = vld [vmem:[#allocation5 + $0x560] sm:$0xff]  ;;  %v2195_v1 = vpack.c.bf16 %v1203_v63, %v1201_v62  ;;  %v1238_v63 = vld [vmem:[#allocation5 + $0x9a8] sm:$0xff] }
  0xf0   :  { %2052 = vmatpush1.bf16.msra.mxu1 %v2051_v5  ;;  %799 = vmatprep.mubr.f32.mxu1 %v76_v9  ;;  %v567_v5 = vld [vmem:[#allocation5 + $0x570] sm:$0xff] }
  0xf1   :  { %2054 = vmatprep.subr.bf16.mxu1 %v2053_v6  ;;  %v570_v6 = vld [vmem:[#allocation5 + $0x588] sm:$0xff]  ;;  %v2095_v8 = vpack.c.bf16 %v567_v5, %v565_v4  ;;  %v1208_v5 = vld [vmem:[#allocation5 + $0x8b8] sm:$0xff] }
  0xf2   :  { %v2097_v9 = vpack.c.bf16 %v572_v7, %v570_v6  ;;  %v1206_v4 = vld [vmem:[#allocation5 + $0x8a8] sm:$0xff]  ;;  %v1205_v7 = vld [vmem:[#allocation5 + $0x8a0] sm:$0xff] }
  0xf3   :  { %v2197_v6 = vpack.c.bf16 %v1208_v5, %v1206_v4 }
  0xf4   :  { %2056 = vmatpush1.bf16.msra.mxu1 %v2055_v12  ;;  %v574_v12 = vld [vmem:[#allocation5 + $0x5a8] sm:$0xff] }
  0xf5   :  { %2058 = vmatprep.subr.bf16.mxu1 %v2057_v13  ;;  %v576_v13 = vld [vmem:[#allocation5 + $0x5b8] sm:$0xff] }
  0xf6   :  { %v2101_v15 = vpack.c.bf16 %v576_v13, %v574_v12  ;;  %v2201_v12 = vpack.c.bf16 %v1212_v11, %v1210_v10  ;;  %v1209_v13 = vld [vmem:[#allocation5 + $0x8c0] sm:$0xff] }
  0xf8   :  { %2060 = vmatpush1.bf16.msra.mxu1 %v2059_v18  ;;  %v578_v18 = vld [vmem:[#allocation5 + $0x5c8] sm:$0xff] }
  0xf9   :  { %2062 = vmatprep.subr.bf16.mxu1 %v2061_v19  ;;  %v580_v19 = vld [vmem:[#allocation5 + $0x5d8] sm:$0xff] }
  0xfa   :  { %v2105_v21 = vpack.c.bf16 %v580_v19, %v578_v18  ;;  %v2205_v18 = vpack.c.bf16 %v1216_v17, %v1214_v16  ;;  %v1213_v19 = vld [vmem:[#allocation5 + $0x8e0] sm:$0xff]  ;;  %v1243_v17 = vld [vmem:[#allocation5 + $0x9d0] sm:$0xff] }
  0xfb   :  { %v1241_v16 = vld [vmem:[#allocation5 + $0x9c0] sm:$0xff] }
  0xfc   :  { %2064 = vmatpush1.bf16.msra.mxu1 %v2063_v24  ;;  %v582_v24 = vld [vmem:[#allocation5 + $0x5e8] sm:$0xff] }
  0xfd   :  { %2066 = vmatprep.subr.bf16.mxu1 %v2065_v25  ;;  %v584_v25 = vld [vmem:[#allocation5 + $0x5f8] sm:$0xff] }
  0xfe   :  { %v2109_v27 = vpack.c.bf16 %v584_v25, %v582_v24  ;;  %v2209_v24 = vpack.c.bf16 %v1220_v23, %v1218_v22  ;;  %v1217_v25 = vld [vmem:[#allocation5 + $0x900] sm:$0xff]  ;;  %v1247_v22 = vld [vmem:[#allocation5 + $0x9f0] sm:$0xff] }
 0x100   :  { %2068 = vmatpush1.bf16.msra.mxu1 %v2067_v0  ;;  %v2111_v0 = vpack.c.bf16 %v583_v29, %v581_v28  ;;  %v1222_v28 = vld [vmem:[#allocation5 + $0x928] sm:$0xff]  ;;  %v1224_v29 = vld [vmem:[#allocation5 + $0x938] sm:$0xff] }
 0x101   :  { %2070 = vmatprep.subr.bf16.mxu1 %v2069_v30  ;;  %v75_v30 = vld [vmem:[#allocation2 + $0x20] sm:$0xff] }
 0x104   :  { %2072 = vmatpush1.bf16.msra.mxu1 %v2071_v35  ;;  %v1186_v35 = vld [vmem:[#allocation5 + $0x808] sm:$0xff] }
 0x105   :  { %2074 = vmatprep.subr.bf16.mxu1 %v2073_v36  ;;  %v1188_v36 = vld [vmem:[#allocation5 + $0x818] sm:$0xff] }
 0x106   :  { %v2177_v38 = vpack.c.bf16 %v1188_v36, %v1186_v35  ;;  %v1221_v35 = vld [vmem:[#allocation5 + $0x920] sm:$0xff]  ;;  %v1223_v36 = vld [vmem:[#allocation5 + $0x930] sm:$0xff] }
 0x108   :  { %2076 = vmatpush1.bf16.msra.mxu1 %v2075_v41  ;;  %v1192_v41 = vld [vmem:[#allocation5 + $0x838] sm:$0xff]  ;;  %2178 = vmatprep.subr.bf16.mxu0 %v2177_v38  ;;  %v1226_v38 = vld [vmem:[#allocation5 + $0x948] sm:$0xff] }
 0x109   :  { %2078 = vmatprep.subr.bf16.mxu1 %v2077_v42  ;;  %v2179_v42 = vpack.c.bf16 %v1187_v39, %v1185_v37  ;;  %v2181_v43 = vpack.c.bf16 %v1192_v41, %v1190_v40  ;;  %v2215_v37 = vpack.c.bf16 %v1223_v36, %v1221_v35  ;;  %v1228_v39 = vld [vmem:[#allocation5 + $0x958] sm:$0xff] }
 0x10a   :  { %v2217_v41 = vpack.c.bf16 %v1228_v39, %v1226_v38 }
 0x10b   :  { %2180 = vmatpush1.bf16.msra.mxu0 %v2179_v42  ;;  %v1225_v42 = vld [vmem:[#allocation5 + $0x940] sm:$0xff] }
 0x10c   :  { %2080 = vmatpush1.bf16.msra.mxu1 %v2079_v46  ;;  %v1196_v46 = vld [vmem:[#allocation5 + $0x858] sm:$0xff]  ;;  %2182 = vmatprep.subr.bf16.mxu0 %v2181_v43  ;;  %v1227_v43 = vld [vmem:[#allocation5 + $0x950] sm:$0xff] }
 0x10d   :  { %2082 = vmatprep.subr.bf16.mxu1 %v2081_v47  ;;  %v2183_v47 = vpack.c.bf16 %v1191_v44, %v1189_v48  ;;  %v2185_v49 = vpack.c.bf16 %v1196_v46, %v1194_v45  ;;  %v2219_v48 = vpack.c.bf16 %v1227_v43, %v1225_v42  ;;  %v1230_v44 = vld [vmem:[#allocation5 + $0x968] sm:$0xff]  ;;  %v1232_v45 = vld [vmem:[#allocation5 + $0x978] sm:$0xff] }
 0x10f   :  { %2184 = vmatpush1.bf16.msra.mxu0 %v2183_v47  ;;  %v2221_v47 = vpack.c.bf16 %v1232_v45, %v1230_v44 }
 0x110   :  { %2084 = vmatpush1.bf16.msra.mxu1 %v2083_v53  ;;  %v1200_v53 = vld [vmem:[#allocation5 + $0x878] sm:$0xff]  ;;  %2186 = vmatprep.subr.bf16.mxu0 %v2185_v49  ;;  %v1229_v49 = vld [vmem:[#allocation5 + $0x960] sm:$0xff] }
 0x111   :  { %2086 = vmatprep.subr.bf16.mxu1 %v2085_v54  ;;  %v2187_v54 = vpack.c.bf16 %v1195_v51, %v1193_v50  ;;  %v2189_v55 = vpack.c.bf16 %v1200_v53, %v1198_v52  ;;  %v1231_v50 = vld [vmem:[#allocation5 + $0x970] sm:$0xff]  ;;  %v2665_v51 = vld [vmem:[#allocation8] sm:$0xff]  ;;  %v2667_v53 = vld [vmem:[#allocation8 + $0x8] sm:$0xff] }
 0x112   :  { %v2223_v52 = vpack.c.bf16 %v1231_v50, %v1229_v49 }
 0x113   :  { %2188 = vmatpush1.bf16.msra.mxu0 %v2187_v54  ;;  %v1234_v54 = vld [vmem:[#allocation5 + $0x988] sm:$0xff] }
 0x114   :  { %2088 = vmatpush1.bf16.msra.mxu1 %v2087_v59  ;;  %v1204_v59 = vld [vmem:[#allocation5 + $0x898] sm:$0xff]  ;;  %2190 = vmatprep.subr.bf16.mxu0 %v2189_v55 }
 0x115   :  { %2090 = vmatprep.subr.bf16.mxu1 %v2089_v60  ;;  %v2191_v60 = vpack.c.bf16 %v1199_v57, %v1197_v56  ;;  %v2193_v61 = vpack.c.bf16 %v1204_v59, %v1202_v58  ;;  %v1236_v55 = vld [vmem:[#allocation5 + $0x998] sm:$0xff]  ;;  %v1233_v58 = vld [vmem:[#allocation5 + $0x980] sm:$0xff]  ;;  %v1235_v59 = vld [vmem:[#allocation5 + $0x990] sm:$0xff] }
 0x116   :  { %v2225_v57 = vpack.c.bf16 %v1236_v55, %v1234_v54 }
 0x117   :  { %2192 = vmatpush1.bf16.msra.mxu0 %v2191_v60 }
 0x118   :  { %2092 = vmatpush1.bf16.msra.mxu1 %v2091_v2  ;;  %2194 = vmatprep.subr.bf16.mxu0 %v2193_v61  ;;  %v2227_v61 = vpack.c.bf16 %v1235_v59, %v1233_v58 }
 0x119   :  { %2094 = vmatprep.subr.bf16.mxu1 %v2093_v3 }
 0x11b   :  { %2196 = vmatpush1.bf16.msra.mxu0 %v2195_v1  ;;  %v1240_v1 = vld [vmem:[#allocation5 + $0x9b8] sm:$0xff] }
 0x11c   :  { %2096 = vmatpush1.bf16.msra.mxu1 %v2095_v8  ;;  %v1207_v8 = vld [vmem:[#allocation5 + $0x8b0] sm:$0xff]  ;;  %2198 = vmatprep.subr.bf16.mxu0 %v2197_v6  ;;  %v2229_v6 = vpack.c.bf16 %v1240_v1, %v1238_v63 }
 0x11d   :  { %2098 = vmatprep.subr.bf16.mxu1 %v2097_v9  ;;  %v2199_v9 = vpack.c.bf16 %v1207_v8, %v1205_v7  ;;  %v1237_v7 = vld [vmem:[#allocation5 + $0x9a0] sm:$0xff]  ;;  %v1239_v8 = vld [vmem:[#allocation5 + $0x9b0] sm:$0xff] }
 0x11e   :  { %v2231_v10 = vpack.c.bf16 %v1239_v8, %v1237_v7 }
 0x11f   :  { %2200 = vmatpush1.bf16.msra.mxu0 %v2199_v9 }
 0x120   :  { %2100 = vmatpush1.bf16.msra.mxu1 %v2099_v14  ;;  %v1211_v14 = vld [vmem:[#allocation5 + $0x8d0] sm:$0xff]  ;;  %2202 = vmatprep.subr.bf16.mxu0 %v2201_v12 }
 0x121   :  { %2102 = vmatprep.subr.bf16.mxu1 %v2101_v15  ;;  %v2203_v15 = vpack.c.bf16 %v1211_v14, %v1209_v13  ;;  %v1242_v13 = vld [vmem:[#allocation5 + $0x9c8] sm:$0xff]  ;;  %v1244_v14 = vld [vmem:[#allocation5 + $0x9d8] sm:$0xff] }
 0x123   :  { %2204 = vmatpush1.bf16.msra.mxu0 %v2203_v15  ;;  %v2233_v15 = vpack.c.bf16 %v1244_v14, %v1242_v13 }
 0x124   :  { %2104 = vmatpush1.bf16.msra.mxu1 %v2103_v20  ;;  %v1215_v20 = vld [vmem:[#allocation5 + $0x8f0] sm:$0xff]  ;;  %2206 = vmatprep.subr.bf16.mxu0 %v2205_v18  ;;  %v1246_v18 = vld [vmem:[#allocation5 + $0x9e8] sm:$0xff] }
 0x125   :  { %2106 = vmatprep.subr.bf16.mxu1 %v2105_v21  ;;  %v2207_v21 = vpack.c.bf16 %v1215_v20, %v1213_v19  ;;  %v2235_v19 = vpack.c.bf16 %v1243_v17, %v1241_v16  ;;  %v1248_v20 = vld [vmem:[#allocation5 + $0x9f8] sm:$0xff] }
 0x126   :  { %v2237_v23 = vpack.c.bf16 %v1248_v20, %v1246_v18  ;;  %v2697_v20 = vld [vmem:[#allocation8 + $0x18] sm:$0xff] }
 0x127   :  { %2208 = vmatpush1.bf16.msra.mxu0 %v2207_v21  ;;  %v1245_v21 = vld [vmem:[#allocation5 + $0x9e0] sm:$0xff] }
 0x128   :  { %2108 = vmatpush1.bf16.msra.mxu1 %v2107_v26  ;;  %v1219_v26 = vld [vmem:[#allocation5 + $0x910] sm:$0xff]  ;;  %2210 = vmatprep.subr.bf16.mxu0 %v2209_v24 }
 0x129   :  { %2110 = vmatprep.subr.bf16.mxu1 %v2109_v27  ;;  %v2211_v27 = vpack.c.bf16 %v1219_v26, %v1217_v25 }
 0x12b   :  { %2212 = vmatpush1.bf16.msra.mxu0 %v2211_v27 }
 0x12c   :  { %2112 = vmatpush1.bf16.msra.mxu1 %v2111_v0  ;;  %v585_v0 = vlaneseq }
 0x12e   :  { %v2660_v40 = vshrl.u32 %v585_v0, 7 }
 0x12f   :  { %800 = vmatmul.mubr.f32.vlgmr.msra.gmra.mrb[2].mxu1 %v75_v30  ;;  %v2213_v30 = vpack.c.bf16 %v1224_v29, %v1222_v28 }
 0x130   :  { %v2663_v46 = vsub.s32 1, %v2660_v40  ;;  %v1135_v7 = vsub.s32 6, %v2660_v40  ;;  %v2692_v16 = vsub.s32 2, %v2660_v40 }
 0x131   :  { %2214 = vmatprep.subr.bf16.mxu0 %v2213_v30 }
 0x132   :  { %2216 = vmatpush1.bf16.msra.mxu0 %v2215_v37  ;;  %v1080_v56 = vrot.slane %v2665_v51, %v2663_v46  ;;  %v1084_v60 = vrot.slane %v2667_v53, %v2663_v46  ;;  %v1140_v18 = vrot.slane %v2667_v53, %v1135_v7 }
 0x133   :  { %2218 = vmatprep.subr.bf16.mxu0 %v2217_v41 }
 0x136   :  { %2220 = vmatpush1.bf16.msra.mxu0 %v2219_v48 }
 0x137   :  { %2222 = vmatprep.subr.bf16.mxu0 %v2221_v47 }
 0x13a   :  { %2224 = vmatpush1.bf16.msra.mxu0 %v2223_v52 }
 0x13b   :  { %2226 = vmatprep.subr.bf16.mxu0 %v2225_v57 }
 0x13e   :  { %2228 = vmatpush1.bf16.msra.mxu0 %v2227_v61 }
 0x13f   :  { %2230 = vmatprep.subr.bf16.mxu0 %v2229_v6 }
 0x141   :  { %v2648_v31 = vpop.f32.mrb[0].mxu0 }
 0x142   :  { %v2650_v32 = vpop.f32.mrb[0].mxu1  ;;  %v2652_v33 = vpop.f32.mrb[1].mxu0  ;;  %2232 = vmatpush1.bf16.msra.mxu0 %v2231_v10 }
 0x143   :  { %v2654_v34 = vpop.f32.mrb[1].mxu1  ;;  %2234 = vmatprep.subr.bf16.mxu0 %v2233_v15  ;;  %v1136_v15 = vrot.slane %v2665_v51, %v1135_v7 }
 0x146   :  { %2236 = vmatpush1.bf16.msra.mxu0 %v2235_v19  ;;  %v2695_v19 = vld [vmem:[#allocation8 + $0x10] sm:$0xff] }
 0x147   :  { %2238 = vmatprep.subr.bf16.mxu0 %v2237_v23 }
 0x161   :  { %v2656_v2 = vpop.f32.mrb[2].mxu0 }
 0x162   :  { %v2658_v3 = vpop.f32.mrb[3].mxu0 }
 0x1a1   :  { %v1072_v62 = vpop.f32.mrb[4].mxu0 }
 0x1a2   :  { %v1085_v4 = vadd.f32 %v1080_v56, %v1072_v62  ;;  %v1074_v5 = vpop.f32.mrb[5].mxu0 }
 0x1a3   :  { %v1086_v9 = vadd.f32 %v1084_v60, %v1074_v5 }
 0x1a4   :  { %v2674_v11 = vmul.f32 %v1085_v4, %v2648_v31  ;;  %v2239_v31 = vpack.c.bf16 %v1247_v22, %v1245_v21  ;;  %v1146_v22 = vrot.slane %v2695_v19, %v2692_v16 }
 0x1a5   :  { %v2677_v12 = vmul.f32 %v1086_v9, %v2652_v33 }
 0x1a6   :  { %2240 = vmatpush1.bf16.msra.mxu0 %v2239_v31  ;;  %v1089_v33 = vrot.slane %v2674_v11, 4  ;;  %v1103_v24 = vmul.f32 %v2674_v11, %v2674_v11 }
 0x1a7   :  { %v1095_v25 = vrot.slane %v2677_v12, 4  ;;  %v1104_v26 = vmul.f32 %v2677_v12, %v2677_v12 }
 0x1a8   :  { %v1090_v27 = vadd.f32 %v1089_v33, %v2674_v11  ;;  %v1105_v28 = vrot.slane %v1103_v24, 4 }
 0x1a9   :  { %v1096_v29 = vadd.f32 %v1095_v25, %v2677_v12  ;;  %v1111_v0 = vrot.slane %v1104_v26, 4  ;;  %v2710_v25 = vsub.s32 0, %v2660_v40 }
 0x1aa   :  { %v1091_v30 = vrot.slane %v1090_v27, 2  ;;  %v1106_v35 = vadd.f32 %v1105_v28, %v1103_v24 }
 0x1ab   :  { %v1097_v36 = vrot.slane %v1096_v29, 2  ;;  %v1112_v37 = vadd.f32 %v1111_v0, %v1104_v26  ;;  %v588_v28 = vrot.slane %v2665_v51, %v2710_v25 }
 0x1ac   :  { %v1092_v38 = vadd.f32 %v1091_v30, %v1090_v27  ;;  %v1107_v39 = vrot.slane %v1106_v35, 2 }
 0x1ad   :  { %v1098_v41 = vadd.f32 %v1097_v36, %v1096_v29  ;;  %v1113_v42 = vrot.slane %v1112_v37, 2  ;;  %v592_v29 = vrot.slane %v2667_v53, %v2710_v25 }
 0x1ae   :  { %v1093_v43 = vrot.slane %v1092_v38, 1  ;;  %v1108_v48 = vadd.f32 %v1107_v39, %v1106_v35 }
 0x1af   :  { %v1099_v44 = vrot.slane %v1098_v41, 1  ;;  %v1114_v45 = vadd.f32 %v1113_v42, %v1112_v37 }
 0x1b0   :  { %v1094_v47 = vadd.f32 %v1093_v43, %v1092_v38  ;;  %v1109_v49 = vrot.slane %v1108_v48, 1 }
 0x1b1   :  { %v1100_v50 = vadd.f32 %v1099_v44, %v1098_v41  ;;  %v1115_v52 = vrot.slane %v1114_v45, 1 }
 0x1b2   :  { %v1101_v54 = vmul.f32 0.125, %v1094_v47  ;;  %v1110_v55 = vadd.f32 %v1109_v49, %v1108_v48 }
 0x1b3   :  { %v1102_v56 = vmul.f32 0.125, %v1100_v50  ;;  %v1116_v57 = vadd.f32 %v1115_v52, %v1114_v45 }
 0x1b4   :  { %v1117_v58 = vmul.f32 0.125, %v1110_v55  ;;  %v1119_v59 = vmul.f32 %v1101_v54, %v1101_v54  ;;  %v1125_v10 = vsub.f32 %v2674_v11, %v1101_v54 }
 0x1b5   :  { %v1118_v60 = vmul.f32 0.125, %v1116_v57  ;;  %v1120_v61 = vmul.f32 %v1102_v56, %v1102_v56  ;;  %v1126_v13 = vsub.f32 %v2677_v12, %v1102_v56  ;;  %v1150_v12 = vrot.slane %v2697_v20, %v2692_v16 }
 0x1b6   :  { %v1121_v62 = vsub.f32 %v1117_v58, %v1119_v59 }
 0x1b7   :  { %v1122_v63 = vsub.f32 %v1118_v60, %v1120_v61 }
 0x1b8   :  { %v1123_v1 = vmax.f32 %v1121_v62, 0.0 }
 0x1b9   :  { %v1124_v4 = vmax.f32 %v1122_v63, 0.0 }
 0x1ba   :  { %v1127_v5 = vadd.f32 1e-05, %v1123_v1 }
 0x1bb   :  { %v1128_v6 = vadd.f32 1e-05, %v1124_v4 }
 0x1bc   :  { %2387 = vrsqrt.f32 %v1127_v5 }
 0x1bd   :  { %2389 = vrsqrt.f32 %v1128_v6 }
 0x1c6   :  { %v2388_v8 = vpop.eup %2387 }
 0x1c7   :  { %v2390_v9 = vpop.eup %2389  ;;  %v1131_v14 = vmul.f32 %v2388_v8, %v1125_v10 }
 0x1c8   :  { %v1132_v17 = vmul.f32 %v2390_v9, %v1126_v13 }
 0x1c9   :  { %v1141_v21 = vmul.f32 %v1136_v15, %v1131_v14 }
 0x1ca   :  { %v1142_v11 = vmul.f32 %v1140_v18, %v1132_v17 }
 0x1cb   :  { %v2703_v23 = vadd.f32 %v1146_v22, %v1141_v21 }
 0x1cc   :  { %v2705_v31 = vadd.f32 %v1150_v12, %v1142_v11 }
 0x1cd   :  { %v1155_v33 = vand.u32 2147483647, %v2703_v23 }
 0x1ce   :  { %v1156_v24 = vand.u32 2147483647, %v2705_v31 }
 0x1cf   :  { %v1157_v26 = vsub.f32 0.0, %v1155_v33 }
 0x1d0   :  { %v1158_v27 = vsub.f32 0.0, %v1156_v24 }
 0x1d1   :  { %v1159_v0 = vmul.f32 1.442695, %v1157_v26 }
 0x1d2   :  { %v1161_v35 = vmul.f32 1.442695, %v1158_v27 }
 0x1d3   :  { %2391 = vpow2.f32 %v1159_v0 }
 0x1d4   :  { %2393 = vpow2.f32 %v1161_v35 }
 0x1dd   :  { %v2392_v63 = vpop.eup %2391 }
 0x1de   :  { %v2394_v5 = vpop.eup %2393  ;;  %v1163_v14 = vadd.f32 1.0, %v2392_v63 }
 0x1df   :  { %v1172_v18 = vadd.f32 1.0, %v2394_v5 }
 0x1e0   :  { %2395 = vlog2.f32 %v1163_v14  ;;  %v1426_v14 = vld [vmem:[#allocation5 + $0xa10] sm:$0xff] }
 0x1e1   :  { %2397 = vlog2.f32 %v1172_v18 }
 0x1ea   :  { %v2396_v0 = vpop.eup %2395 }
 0x1eb   :  { %v2398_v35 = vpop.eup %2397 }
 0x202   :  { %v801_v30 = vpop.f32.mrb[2].mxu1 }
 0x203   :  { %v2716_v36 = vadd.f32 %v801_v30, %v588_v28  ;;  %v803_v37 = vpop.f32.mrb[3].mxu1  ;;  %v1166_v28 = vmul.f32 -0.5, %v2392_v63  ;;  %v853_v30 = vsub.s32 5, %v2660_v40 }
 0x204   :  { %v2718_v38 = vadd.f32 %v803_v37, %v592_v29  ;;  %v1175_v29 = vmul.f32 -0.5, %v2394_v5 }
 0x205   :  { %v806_v39 = vrot.slane %v2716_v36, 4  ;;  %v821_v41 = vmul.f32 %v2716_v36, %v2716_v36  ;;  %v1167_v37 = vadd.f32 1.0, %v1166_v28  ;;  %v1437_v28 = vld [vmem:[#allocation5 + $0xa68] sm:$0xff] }
 0x206   :  { %v812_v42 = vrot.slane %v2718_v38, 4  ;;  %v822_v43 = vmul.f32 %v2718_v38, %v2718_v38 }
 0x207   :  { %v807_v48 = vadd.f32 %v2716_v36, %v806_v39  ;;  %v823_v44 = vrot.slane %v821_v41, 4  ;;  %v1176_v39 = vadd.f32 1.0, %v1175_v29  ;;  %v1439_v29 = vld [vmem:[#allocation5 + $0xa78] sm:$0xff] }
 0x208   :  { %v813_v45 = vadd.f32 %v2718_v38, %v812_v42  ;;  %v829_v47 = vrot.slane %v822_v43, 4  ;;  %v1178_v42 = vand.u32 2147483647, %v2394_v5 }
 0x209   :  { %v808_v49 = vrot.slane %v807_v48, 2  ;;  %v824_v50 = vadd.f32 %v823_v44, %v821_v41  ;;  %v1169_v41 = vand.u32 2147483647, %v2392_v63  ;;  %v1174_v44 = vmul.f32 0.6931472, %v2398_v35  ;;  %v1438_v35 = vld [vmem:[#allocation5 + $0xa70] sm:$0xff] }
 0x20a   :  { %v814_v52 = vrot.slane %v813_v45, 2  ;;  %v830_v54 = vadd.f32 %v829_v47, %v822_v43  ;;  %v1165_v43 = vmul.f32 0.6931472, %v2396_v0  ;;  %vm1179_vm1 = vcmp.lt.f32.partialorder %v1178_v42, 0.0004427343 }
 0x20b   :  { %v809_v55 = vadd.f32 %v808_v49, %v807_v48  ;;  %v825_v56 = vrot.slane %v824_v50, 2  ;;  %vm1170_vm0 = vcmp.lt.f32.partialorder %v1169_v41, 0.0004427343  ;;  %v2253_v0 = vpack.c.bf16 %v1439_v29, %v1437_v28  ;;  %v1443_v41 = vld [vmem:[#allocation5 + $0xa98] sm:$0xff]  ;;  %v1473_v28 = vld [vmem:[#allocation5 + $0xb88] sm:$0xff] }
 0x20c   :  { %v815_v57 = vadd.f32 %v814_v52, %v813_v45  ;;  %v831_v58 = vrot.slane %v830_v54, 2  ;;  %v854_v45 = vrot.slane %v2665_v51, %v853_v30  ;;  %v1168_v52 = vmul.f32 %v2392_v63, %v1167_v37  ;;  %v1475_v29 = vld [vmem:[#allocation5 + $0xb98] sm:$0xff] }
 0x20d   :  { %v810_v59 = vrot.slane %v809_v55, 1  ;;  %v826_v60 = vadd.f32 %v825_v56, %v824_v50  ;;  %v858_v50 = vrot.slane %v2667_v53, %v853_v30  ;;  %v1177_v56 = vmul.f32 %v2394_v5, %v1176_v39  ;;  %v1436_v30 = vld [vmem:[#allocation5 + $0xa60] sm:$0xff]  ;;  %v1441_v39 = vld [vmem:[#allocation5 + $0xa88] sm:$0xff] }
 0x20e   :  { %v816_v61 = vrot.slane %v815_v57, 1  ;;  %v832_v62 = vadd.f32 %v831_v58, %v830_v54  ;;  %v1154_v63 = vmax.f32 %v2705_v31, 0.0  ;;  %v1428_v31 = vld [vmem:[#allocation5 + $0xa20] sm:$0xff]  ;;  %v2255_v37 = vpack.c.bf16 %v1438_v35, %v1436_v30 }
 0x20f   :  { %v811_v1 = vadd.f32 %v810_v59, %v809_v55  ;;  %v827_v4 = vrot.slane %v826_v60, 1  ;;  %v1171_v59 = vsel %vm1170_vm0, %v1168_v52, %v1165_v43  ;;  %v2257_v42 = vpack.c.bf16 %v1443_v41, %v1441_v39  ;;  %v1440_v43 = vld [vmem:[#allocation5 + $0xa80] sm:$0xff]  ;;  %v1446_v52 = vld [vmem:[#allocation5 + $0xab0] sm:$0xff]  ;;  %v1477_v39 = vld [vmem:[#allocation5 + $0xba8] sm:$0xff] }
 0x210   :  { %v817_v6 = vadd.f32 %v816_v61, %v815_v57  ;;  %v833_v7 = vrot.slane %v832_v62, 1  ;;  %v864_v57 = vrot.slane %v2695_v19, %v2663_v46  ;;  %v2289_v30 = vpack.c.bf16 %v1475_v29, %v1473_v28  ;;  %v1472_v35 = vld [vmem:[#allocation5 + $0xb80] sm:$0xff]  ;;  %v1479_v41 = vld [vmem:[#allocation5 + $0xbb8] sm:$0xff] }
 0x211   :  { %v819_v8 = vmul.f32 0.125, %v811_v1  ;;  %v828_v9 = vadd.f32 %v827_v4, %v826_v60  ;;  %v1180_v60 = vsel %vm1179_vm1, %v1177_v56, %v1174_v44  ;;  %v1451_v56 = vld [vmem:[#allocation5 + $0xad8] sm:$0xff] }
 0x212   :  { %v820_v10 = vmul.f32 0.125, %v817_v6  ;;  %v834_v13 = vadd.f32 %v833_v7, %v832_v62  ;;  %v1182_v6 = vadd.f32 %v1180_v60, %v1154_v63  ;;  %v1455_v60 = vld [vmem:[#allocation5 + $0xaf8] sm:$0xff]  ;;  %v1454_v63 = vld [vmem:[#allocation5 + $0xaf0] sm:$0xff] }
 0x213   :  { %v835_v15 = vmul.f32 0.125, %v828_v9  ;;  %v837_v17 = vmul.f32 %v819_v8, %v819_v8  ;;  %v843_v48 = vsub.f32 %v2716_v36, %v819_v8  ;;  %v868_v36 = vrot.slane %v2697_v20, %v2663_v46  ;;  %v1425_v9 = vld [vmem:[#allocation5 + $0xa08] sm:$0xff] }
 0x214   :  { %v836_v21 = vmul.f32 0.125, %v834_v13  ;;  %v838_v22 = vmul.f32 %v820_v10, %v820_v10  ;;  %v844_v49 = vsub.f32 %v2718_v38, %v820_v10  ;;  %v1153_v38 = vmax.f32 %v2703_v23, 0.0  ;;  %v1427_v10 = vld [vmem:[#allocation5 + $0xa18] sm:$0xff]  ;;  %v1424_v13 = vld [vmem:[#allocation5 + $0xa00] sm:$0xff]  ;;  %v1429_v23 = vld [vmem:[#allocation5 + $0xa28] sm:$0xff] }
 0x215   :  { %v839_v11 = vsub.f32 %v835_v15, %v837_v17  ;;  %v2241_v46 = vpack.c.bf16 %v1427_v10, %v1425_v9  ;;  %v2243_v15 = vpack.c.bf16 %v1426_v14, %v1424_v13  ;;  %v1431_v17 = vld [vmem:[#allocation5 + $0xa38] sm:$0xff]  ;;  %v1461_v9 = vld [vmem:[#allocation5 + $0xb28] sm:$0xff]  ;;  %v1460_v14 = vld [vmem:[#allocation5 + $0xb20] sm:$0xff] }
 0x216   :  { %v840_v12 = vsub.f32 %v836_v21, %v838_v22  ;;  %v1181_v4 = vadd.f32 %v1171_v59, %v1153_v38  ;;  %v2245_v18 = vpack.c.bf16 %v1431_v17, %v1429_v23  ;;  %v1430_v21 = vld [vmem:[#allocation5 + $0xa30] sm:$0xff]  ;;  %v1453_v59 = vld [vmem:[#allocation5 + $0xae8] sm:$0xff]  ;;  %v1463_v10 = vld [vmem:[#allocation5 + $0xb38] sm:$0xff] }
 0x217   :  { %v841_v33 = vmax.f32 %v839_v11, 0.0  ;;  %2242 = vmatprep.subr.bf16.mxu0 %v2241_v46  ;;  %v2247_v22 = vpack.c.bf16 %v1430_v21, %v1428_v31  ;;  %v1433_v11 = vld [vmem:[#allocation5 + $0xa48] sm:$0xff]  ;;  %v2269_v38 = vpack.c.bf16 %v1455_v60, %v1453_v59  ;;  %v2277_v13 = vpack.c.bf16 %v1463_v10, %v1461_v9  ;;  %v1467_v17 = vld [vmem:[#allocation5 + $0xb58] sm:$0xff]  ;;  %v1464_v21 = vld [vmem:[#allocation5 + $0xb40] sm:$0xff] }
 0x218   :  { %v842_v24 = vmax.f32 %v840_v12, 0.0  ;;  %v1435_v12 = vld [vmem:[#allocation5 + $0xa58] sm:$0xff]  ;;  %v1465_v23 = vld [vmem:[#allocation5 + $0xb48] sm:$0xff]  ;;  %v1486_v59 = vld [vmem:[#allocation5 + $0xbf0] sm:$0xff] }
 0x219   :  { %v845_v26 = vadd.f32 1e-05, %v841_v33  ;;  %v2249_v33 = vpack.c.bf16 %v1435_v12, %v1433_v11  ;;  %v2281_v31 = vpack.c.bf16 %v1467_v17, %v1465_v23  ;;  %v1469_v11 = vld [vmem:[#allocation5 + $0xb68] sm:$0xff]  ;;  %v1471_v12 = vld [vmem:[#allocation5 + $0xb78] sm:$0xff] }
 0x21a   :  { %v846_v27 = vadd.f32 1e-05, %v842_v24  ;;  %v1432_v24 = vld [vmem:[#allocation5 + $0xa40] sm:$0xff] }
 0x21b   :  { %2399 = vrsqrt.f32 %v845_v26  ;;  %v1434_v26 = vld [vmem:[#allocation5 + $0xa50] sm:$0xff] }
 0x21c   :  { %2401 = vrsqrt.f32 %v846_v27  ;;  %v2251_v27 = vpack.c.bf16 %v1434_v26, %v1432_v24  ;;  %v2285_v24 = vpack.c.bf16 %v1471_v12, %v1469_v11  ;;  %v1468_v26 = vld [vmem:[#allocation5 + $0xb60] sm:$0xff] }
 0x225   :  { %v2400_v47 = vpop.eup %2399 }
 0x226   :  { %v2402_v54 = vpop.eup %2401  ;;  %v849_v55 = vmul.f32 %v2400_v47, %v843_v48  ;;  %v1442_v48 = vld [vmem:[#allocation5 + $0xa90] sm:$0xff]  ;;  %v1447_v47 = vld [vmem:[#allocation5 + $0xab8] sm:$0xff] }
 0x227   :  { %v850_v58 = vmul.f32 %v2402_v54, %v844_v49  ;;  %v2259_v44 = vpack.c.bf16 %v1442_v48, %v1440_v43  ;;  %v2293_v43 = vpack.c.bf16 %v1479_v41, %v1477_v39  ;;  %v1476_v48 = vld [vmem:[#allocation5 + $0xba0] sm:$0xff] }
 0x228   :  { %v859_v61 = vmul.f32 %v854_v45, %v849_v55  ;;  %v1445_v45 = vld [vmem:[#allocation5 + $0xaa8] sm:$0xff] }
 0x229   :  { %v860_v62 = vmul.f32 %v858_v50, %v850_v58  ;;  %v2261_v49 = vpack.c.bf16 %v1447_v47, %v1445_v45  ;;  %v1444_v50 = vld [vmem:[#allocation5 + $0xaa0] sm:$0xff]  ;;  %v1449_v55 = vld [vmem:[#allocation5 + $0xac8] sm:$0xff]  ;;  %v1483_v47 = vld [vmem:[#allocation5 + $0xbd8] sm:$0xff] }
 0x22a   :  { %v869_v1 = vadd.f32 %v864_v57, %v859_v61  ;;  %v2263_v54 = vpack.c.bf16 %v1446_v52, %v1444_v50  ;;  %v1448_v57 = vld [vmem:[#allocation5 + $0xac0] sm:$0xff]  ;;  %v2265_v58 = vpack.c.bf16 %v1451_v56, %v1449_v55  ;;  %v1481_v45 = vld [vmem:[#allocation5 + $0xbc8] sm:$0xff]  ;;  %v1487_v56 = vld [vmem:[#allocation5 + $0xbf8] sm:$0xff] }
 0x22b   :  { %v870_v5 = vadd.f32 %v868_v36, %v860_v62  ;;  %v1450_v36 = vld [vmem:[#allocation5 + $0xad0] sm:$0xff]  ;;  %v1452_v62 = vld [vmem:[#allocation5 + $0xae0] sm:$0xff]  ;;  %v2297_v50 = vpack.c.bf16 %v1483_v47, %v1481_v45  ;;  %v1485_v55 = vld [vmem:[#allocation5 + $0xbe8] sm:$0xff] }
 0x22c   :  { %v1183_v7 = vmul.f32 %v1181_v4, %v869_v1  ;;  %v2267_v61 = vpack.c.bf16 %v1450_v36, %v1448_v57  ;;  %v1457_v1 = vld [vmem:[#allocation5 + $0xb08] sm:$0xff]  ;;  %v1459_v4 = vld [vmem:[#allocation5 + $0xb18] sm:$0xff]  ;;  %v1480_v52 = vld [vmem:[#allocation5 + $0xbc0] sm:$0xff] }
 0x22d   :  { %v1184_v8 = vmul.f32 %v1182_v6, %v870_v5  ;;  %v2271_v5 = vpack.c.bf16 %v1454_v63, %v1452_v62  ;;  %v2273_v6 = vpack.c.bf16 %v1459_v4, %v1457_v1  ;;  %v1484_v36 = vld [vmem:[#allocation5 + $0xbe0] sm:$0xff] }
 0x22e   :  { %v2303_v60 = vpack.c.bf16 %v1486_v59, %v1484_v36 }
 0x22f   :  { %1321 = vmatprep.mubr.f32.mxu0 %v1184_v8  ;;  %v1458_v8 = vld [vmem:[#allocation5 + $0xb10] sm:$0xff] }
 0x230   :  { %1322 = vmatmul.mubr.f32.vlgmr.msra.gmra.mrb[6].mxu0 %v1183_v7  ;;  %v1456_v7 = vld [vmem:[#allocation5 + $0xb00] sm:$0xff] }
 0x231   :  { %2244 = vmatpush1.bf16.msra.mxu0 %v2243_v15  ;;  %v2275_v46 = vpack.c.bf16 %v1458_v8, %v1456_v7  ;;  %v1462_v15 = vld [vmem:[#allocation5 + $0xb30] sm:$0xff] }
 0x232   :  { %2246 = vmatprep.subr.bf16.mxu0 %v2245_v18  ;;  %v2279_v18 = vpack.c.bf16 %v1462_v15, %v1460_v14 }
 0x235   :  { %2248 = vmatpush1.bf16.msra.mxu0 %v2247_v22  ;;  %v1466_v22 = vld [vmem:[#allocation5 + $0xb50] sm:$0xff] }
 0x236   :  { %2250 = vmatprep.subr.bf16.mxu0 %v2249_v33  ;;  %v2283_v33 = vpack.c.bf16 %v1466_v22, %v1464_v21 }
 0x239   :  { %2252 = vmatpush1.bf16.msra.mxu0 %v2251_v27  ;;  %v1470_v27 = vld [vmem:[#allocation5 + $0xb70] sm:$0xff] }
 0x23a   :  { %2254 = vmatprep.subr.bf16.mxu0 %v2253_v0  ;;  %v2287_v0 = vpack.c.bf16 %v1470_v27, %v1468_v26 }
 0x23d   :  { %2256 = vmatpush1.bf16.msra.mxu0 %v2255_v37  ;;  %v1474_v37 = vld [vmem:[#allocation5 + $0xb90] sm:$0xff] }
 0x23e   :  { %2258 = vmatprep.subr.bf16.mxu0 %v2257_v42  ;;  %v2291_v42 = vpack.c.bf16 %v1474_v37, %v1472_v35 }
 0x241   :  { %2260 = vmatpush1.bf16.msra.mxu0 %v2259_v44  ;;  %v1478_v44 = vld [vmem:[#allocation5 + $0xbb0] sm:$0xff] }
 0x242   :  { %2262 = vmatprep.subr.bf16.mxu0 %v2261_v49  ;;  %v2295_v49 = vpack.c.bf16 %v1478_v44, %v1476_v48 }
 0x245   :  { %2264 = vmatpush1.bf16.msra.mxu0 %v2263_v54  ;;  %v1482_v54 = vld [vmem:[#allocation5 + $0xbd0] sm:$0xff] }
 0x246   :  { %2266 = vmatprep.subr.bf16.mxu0 %v2265_v58  ;;  %v2299_v57 = vpack.c.bf16 %v1482_v54, %v1480_v52  ;;  %v2301_v58 = vpack.c.bf16 %v1487_v56, %v1485_v55  ;;  %v2747_v52 = vsub.s32 3, %v2660_v40 }
 0x249   :  { %2268 = vmatpush1.bf16.msra.mxu0 %v2267_v61  ;;  %v1252_v61 = vrot.slane %v2665_v51, %v2692_v16 }
 0x24a   :  { %2270 = vmatprep.subr.bf16.mxu0 %v2269_v38  ;;  %v1256_v38 = vrot.slane %v2667_v53, %v2692_v16 }
 0x24d   :  { %2272 = vmatpush1.bf16.msra.mxu0 %v2271_v5 }
 0x24e   :  { %2274 = vmatprep.subr.bf16.mxu0 %v2273_v6 }
 0x251   :  { %2276 = vmatpush1.bf16.msra.mxu0 %v2275_v46 }
 0x252   :  { %2278 = vmatprep.subr.bf16.mxu0 %v2277_v13 }
 0x255   :  { %2280 = vmatpush1.bf16.msra.mxu0 %v2279_v18 }
 0x256   :  { %2282 = vmatprep.subr.bf16.mxu0 %v2281_v31 }
 0x259   :  { %2284 = vmatpush1.bf16.msra.mxu0 %v2283_v33 }
 0x25a   :  { %2286 = vmatprep.subr.bf16.mxu0 %v2285_v24 }
 0x25d   :  { %2288 = vmatpush1.bf16.msra.mxu0 %v2287_v0 }
 0x25e   :  { %2290 = vmatprep.subr.bf16.mxu0 %v2289_v30 }
 0x261   :  { %2292 = vmatpush1.bf16.msra.mxu0 %v2291_v42 }
 0x262   :  { %2294 = vmatprep.subr.bf16.mxu0 %v2293_v43 }
 0x265   :  { %2296 = vmatpush1.bf16.msra.mxu0 %v2295_v49 }
 0x266   :  { %2298 = vmatprep.subr.bf16.mxu0 %v2297_v50  ;;  %v1376_v50 = vsub.s32 7, %v2660_v40 }
 0x268   :  { %v1377_v55 = vrot.slane %v2665_v51, %v1376_v50 }
 0x269   :  { %2300 = vmatpush1.bf16.msra.mxu0 %v2299_v57 }
 0x26a   :  { %2302 = vmatprep.subr.bf16.mxu0 %v2301_v58  ;;  %v1381_v58 = vrot.slane %v2667_v53, %v1376_v50  ;;  %v1673_v50 = vld [vmem:[#allocation5 + $0xc50] sm:$0xff] }
 0x26d   :  { %2304 = vmatpush1.bf16.msra.mxu0 %v2303_v60  ;;  %v1387_v60 = vrot.slane %v2695_v19, %v2747_v52 }
 0x303   :  { %v1323_v62 = vpop.f32.mrb[6].mxu0 }
 0x304   :  { %v1324_v63 = vadd.f32 %v1323_v62, %v1252_v61  ;;  %v1325_v1 = vpop.f32.mrb[7].mxu0 }
 0x305   :  { %v1326_v4 = vadd.f32 %v1325_v1, %v1256_v38  ;;  %v1391_v38 = vrot.slane %v2697_v20, %v2747_v52 }
 0x306   :  { %v1328_v5 = vmul.f32 %v1324_v63, %v2650_v32 }
 0x307   :  { %v1329_v6 = vmul.f32 %v1326_v4, %v2654_v34 }
 0x308   :  { %v1330_v7 = vrot.slane %v1328_v5, 4  ;;  %v1344_v8 = vmul.f32 %v1328_v5, %v1328_v5 }
 0x309   :  { %v1336_v9 = vrot.slane %v1329_v6, 4  ;;  %v1345_v10 = vmul.f32 %v1329_v6, %v1329_v6 }
 0x30a   :  { %v1331_v46 = vadd.f32 %v1330_v7, %v1328_v5  ;;  %v1346_v13 = vrot.slane %v1344_v8, 4 }
 0x30b   :  { %v1337_v14 = vadd.f32 %v1336_v9, %v1329_v6  ;;  %v1352_v15 = vrot.slane %v1345_v10, 4 }
 0x30c   :  { %v1332_v23 = vrot.slane %v1331_v46, 2  ;;  %v1347_v17 = vadd.f32 %v1346_v13, %v1344_v8 }
 0x30d   :  { %v1338_v18 = vrot.slane %v1337_v14, 2  ;;  %v1353_v16 = vadd.f32 %v1352_v15, %v1345_v10 }
 0x30e   :  { %v1333_v31 = vadd.f32 %v1332_v23, %v1331_v46  ;;  %v1348_v21 = vrot.slane %v1347_v17, 2 }
 0x30f   :  { %v1339_v22 = vadd.f32 %v1338_v18, %v1337_v14  ;;  %v1354_v11 = vrot.slane %v1353_v16, 2 }
 0x310   :  { %v1334_v12 = vrot.slane %v1333_v31, 1  ;;  %v1349_v32 = vadd.f32 %v1348_v21, %v1347_v17 }
 0x311   :  { %v1340_v33 = vrot.slane %v1339_v22, 1  ;;  %v1355_v34 = vadd.f32 %v1354_v11, %v1353_v16 }
 0x312   :  { %v1335_v24 = vadd.f32 %v1334_v12, %v1333_v31  ;;  %v1350_v26 = vrot.slane %v1349_v32, 1 }
 0x313   :  { %v1341_v27 = vadd.f32 %v1340_v33, %v1339_v22  ;;  %v1356_v28 = vrot.slane %v1355_v34, 1 }
 0x314   :  { %v1342_v29 = vmul.f32 0.125, %v1335_v24  ;;  %v1351_v0 = vadd.f32 %v1350_v26, %v1349_v32 }
 0x315   :  { %v1343_v30 = vmul.f32 0.125, %v1341_v27  ;;  %v1357_v35 = vadd.f32 %v1356_v28, %v1355_v34  ;;  %v1664_v27 = vld [vmem:[#allocation5 + $0xc08] sm:$0xff]  ;;  %v1666_v28 = vld [vmem:[#allocation5 + $0xc18] sm:$0xff] }
 0x316   :  { %v1358_v37 = vmul.f32 0.125, %v1351_v0  ;;  %v1360_v39 = vmul.f32 %v1342_v29, %v1342_v29  ;;  %v1366_v54 = vsub.f32 %v1328_v5, %v1342_v29  ;;  %v2305_v29 = vpack.c.bf16 %v1666_v28, %v1664_v27  ;;  %v1663_v0 = vld [vmem:[#allocation5 + $0xc00] sm:$0xff]  ;;  %v1704_v27 = vld [vmem:[#allocation5 + $0xd48] sm:$0xff]  ;;  %v1706_v28 = vld [vmem:[#allocation5 + $0xd58] sm:$0xff] }
 0x317   :  { %v1359_v41 = vmul.f32 0.125, %v1357_v35  ;;  %v1361_v42 = vmul.f32 %v1343_v30, %v1343_v30  ;;  %v1367_v57 = vsub.f32 %v1329_v6, %v1343_v30  ;;  %v1665_v30 = vld [vmem:[#allocation5 + $0xc10] sm:$0xff] }
 0x318   :  { %v1362_v43 = vsub.f32 %v1358_v37, %v1360_v39  ;;  %v2307_v35 = vpack.c.bf16 %v1665_v30, %v1663_v0  ;;  %2306 = vmatprep.subr.bf16.mxu1 %v2305_v29  ;;  %v1668_v37 = vld [vmem:[#allocation5 + $0xc28] sm:$0xff]  ;;  %v1670_v39 = vld [vmem:[#allocation5 + $0xc38] sm:$0xff]  ;;  %v2345_v0 = vpack.c.bf16 %v1706_v28, %v1704_v27  ;;  %v1703_v30 = vld [vmem:[#allocation5 + $0xd40] sm:$0xff] }
 0x319   :  { %v1363_v48 = vsub.f32 %v1359_v41, %v1361_v42  ;;  %v2309_v41 = vpack.c.bf16 %v1670_v39, %v1668_v37  ;;  %v1667_v42 = vld [vmem:[#allocation5 + $0xc20] sm:$0xff]  ;;  %v1708_v37 = vld [vmem:[#allocation5 + $0xd68] sm:$0xff]  ;;  %v1710_v39 = vld [vmem:[#allocation5 + $0xd78] sm:$0xff] }
 0x31a   :  { %v1364_v44 = vmax.f32 %v1362_v43, 0.0  ;;  %2308 = vmatpush1.bf16.msra.mxu1 %v2307_v35  ;;  %v1669_v43 = vld [vmem:[#allocation5 + $0xc30] sm:$0xff] }
 0x31b   :  { %v1365_v45 = vmax.f32 %v1363_v48, 0.0  ;;  %v2311_v48 = vpack.c.bf16 %v1669_v43, %v1667_v42  ;;  %2310 = vmatprep.subr.bf16.mxu1 %v2309_v41  ;;  %v1705_v35 = vld [vmem:[#allocation5 + $0xd50] sm:$0xff]  ;;  %v2349_v42 = vpack.c.bf16 %v1710_v39, %v1708_v37  ;;  %v1707_v43 = vld [vmem:[#allocation5 + $0xd60] sm:$0xff] }
 0x31c   :  { %v1368_v47 = vadd.f32 1e-05, %v1364_v44  ;;  %v1672_v44 = vld [vmem:[#allocation5 + $0xc48] sm:$0xff]  ;;  %v2347_v41 = vpack.c.bf16 %v1705_v35, %v1703_v30 }
 0x31d   :  { %v1369_v49 = vadd.f32 1e-05, %v1365_v45  ;;  %v1674_v45 = vld [vmem:[#allocation5 + $0xc58] sm:$0xff] }
 0x31e   :  { %2403 = vrsqrt.f32 %v1368_v47  ;;  %2312 = vmatpush1.bf16.msra.mxu1 %v2311_v48  ;;  %v2313_v47 = vpack.c.bf16 %v1674_v45, %v1672_v44  ;;  %v1709_v48 = vld [vmem:[#allocation5 + $0xd70] sm:$0xff]  ;;  %v1712_v44 = vld [vmem:[#allocation5 + $0xd88] sm:$0xff]  ;;  %v1714_v45 = vld [vmem:[#allocation5 + $0xd98] sm:$0xff] }
 0x31f   :  { %2405 = vrsqrt.f32 %v1369_v49  ;;  %v1671_v49 = vld [vmem:[#allocation5 + $0xc40] sm:$0xff] }
 0x320   :  { %2314 = vmatprep.subr.bf16.mxu1 %v2313_v47  ;;  %v2351_v47 = vpack.c.bf16 %v1709_v48, %v1707_v43 }
 0x328   :  { %v2404_v56 = vpop.eup %2403 }
 0x329   :  { %v2406_v36 = vpop.eup %2405  ;;  %v1372_v59 = vmul.f32 %v2404_v56, %v1366_v54  ;;  %v2315_v54 = vpack.c.bf16 %v1673_v50, %v1671_v49  ;;  %v1678_v56 = vld [vmem:[#allocation5 + $0xc78] sm:$0xff]  ;;  %v2353_v49 = vpack.c.bf16 %v1714_v45, %v1712_v44  ;;  %v1711_v50 = vld [vmem:[#allocation5 + $0xd80] sm:$0xff] }
 0x32a   :  { %v1373_v61 = vmul.f32 %v2406_v36, %v1367_v57  ;;  %v1677_v36 = vld [vmem:[#allocation5 + $0xc70] sm:$0xff] }
 0x32b   :  { %v1382_v62 = vmul.f32 %v1377_v55, %v1372_v59  ;;  %2316 = vmatpush1.bf16.msra.mxu1 %v2315_v54  ;;  %v1676_v55 = vld [vmem:[#allocation5 + $0xc68] sm:$0xff]  ;;  %v1713_v54 = vld [vmem:[#allocation5 + $0xd90] sm:$0xff] }
 0x32c   :  { %v1383_v63 = vmul.f32 %v1381_v58, %v1373_v61  ;;  %v2317_v57 = vpack.c.bf16 %v1678_v56, %v1676_v55  ;;  %v1675_v58 = vld [vmem:[#allocation5 + $0xc60] sm:$0xff]  ;;  %v1682_v61 = vld [vmem:[#allocation5 + $0xc98] sm:$0xff]  ;;  %v1716_v55 = vld [vmem:[#allocation5 + $0xda8] sm:$0xff] }
 0x32d   :  { %v1392_v1 = vadd.f32 %v1387_v60, %v1382_v62  ;;  %v2319_v59 = vpack.c.bf16 %v1677_v36, %v1675_v58  ;;  %v1680_v60 = vld [vmem:[#allocation5 + $0xc88] sm:$0xff]  ;;  %v1679_v62 = vld [vmem:[#allocation5 + $0xc80] sm:$0xff]  ;;  %v1718_v56 = vld [vmem:[#allocation5 + $0xdb8] sm:$0xff] }
 0x32e   :  { %v1393_v4 = vadd.f32 %v1391_v38, %v1383_v63  ;;  %2318 = vmatprep.subr.bf16.mxu1 %v2317_v57  ;;  %v2321_v38 = vpack.c.bf16 %v1682_v61, %v1680_v60  ;;  %v1681_v63 = vld [vmem:[#allocation5 + $0xc90] sm:$0xff]  ;;  %v2355_v57 = vpack.c.bf16 %v1713_v54, %v1711_v50  ;;  %v2357_v58 = vpack.c.bf16 %v1718_v56, %v1716_v55  ;;  %v1715_v36 = vld [vmem:[#allocation5 + $0xda0] sm:$0xff]  ;;  %v1720_v60 = vld [vmem:[#allocation5 + $0xdc8] sm:$0xff] }
 0x32f   :  { %v1396_v5 = vand.u32 2147483647, %v1392_v1  ;;  %v1394_v34 = vmax.f32 %v1392_v1, 0.0  ;;  %2320 = vmatpush1.bf16.msra.mxu1 %v2319_v59  ;;  %v2323_v1 = vpack.c.bf16 %v1681_v63, %v1679_v62  ;;  %v1717_v59 = vld [vmem:[#allocation5 + $0xdb0] sm:$0xff]  ;;  %v1722_v61 = vld [vmem:[#allocation5 + $0xdd8] sm:$0xff]  ;;  %v1719_v63 = vld [vmem:[#allocation5 + $0xdc0] sm:$0xff] }
 0x330   :  { %v1397_v7 = vand.u32 2147483647, %v1393_v4  ;;  %v1395_v12 = vmax.f32 %v1393_v4, 0.0  ;;  %2322 = vmatprep.subr.bf16.mxu1 %v2321_v38  ;;  %v1684_v4 = vld [vmem:[#allocation5 + $0xca8] sm:$0xff]  ;;  %v2359_v38 = vpack.c.bf16 %v1717_v59, %v1715_v36  ;;  %v2361_v62 = vpack.c.bf16 %v1722_v61, %v1720_v60  ;;  %v2429_v61 = vld [vmem:[#allocation8 + $0x10] sm:$0xff] }
 0x331   :  { %v1398_v51 = vsub.f32 0.0, %v1396_v5  ;;  %v1686_v5 = vld [vmem:[#allocation5 + $0xcb8] sm:$0xff]  ;;  %v1625_v59 = vsub.s32 4, %v2660_v40 }
 0x332   :  { %v1399_v8 = vsub.f32 0.0, %v1397_v7  ;;  %v2325_v7 = vpack.c.bf16 %v1686_v5, %v1684_v4  ;;  %v1724_v4 = vld [vmem:[#allocation5 + $0xde8] sm:$0xff]  ;;  %v1726_v5 = vld [vmem:[#allocation5 + $0xdf8] sm:$0xff] }
 0x333   :  { %v1400_v6 = vmul.f32 1.442695, %v1398_v51  ;;  %2324 = vmatpush1.bf16.msra.mxu1 %v2323_v1  ;;  %v1683_v51 = vld [vmem:[#allocation5 + $0xca0] sm:$0xff]  ;;  %v1721_v1 = vld [vmem:[#allocation5 + $0xdd0] sm:$0xff] }
 0x334   :  { %v1402_v9 = vmul.f32 1.442695, %v1399_v8  ;;  %v1685_v8 = vld [vmem:[#allocation5 + $0xcb0] sm:$0xff]  ;;  %2326 = vmatprep.subr.bf16.mxu1 %v2325_v7  ;;  %v2363_v7 = vpack.c.bf16 %v1721_v1, %v1719_v63  ;;  %v2430_v1 = vld [vmem:[#allocation8 + $0x18] sm:$0xff] }
 0x335   :  { %2407 = vpow2.f32 %v1400_v6  ;;  %v2327_v6 = vpack.c.bf16 %v1685_v8, %v1683_v51  ;;  %v2365_v51 = vpack.c.bf16 %v1726_v5, %v1724_v4  ;;  %v1723_v8 = vld [vmem:[#allocation5 + $0xde0] sm:$0xff]  ;;  %v1620_v4 = vrot.slane %v2430_v1, %v2710_v25 }
 0x336   :  { %2409 = vpow2.f32 %v1402_v9  ;;  %v1688_v9 = vld [vmem:[#allocation5 + $0xcc8] sm:$0xff] }
 0x337   :  { %2328 = vmatpush1.bf16.msra.mxu1 %v2327_v6  ;;  %v1725_v6 = vld [vmem:[#allocation5 + $0xdf0] sm:$0xff] }
 0x33f   :  { %v2408_v53 = vpop.eup %2407 }
 0x340   :  { %v2410_v10 = vpop.eup %2409  ;;  %v1404_v46 = vadd.f32 1.0, %v2408_v53  ;;  %v1407_v13 = vmul.f32 -0.5, %v2408_v53  ;;  %v1410_v23 = vand.u32 2147483647, %v2408_v53 }
 0x341   :  { %v1413_v19 = vadd.f32 1.0, %v2410_v10  ;;  %v1416_v20 = vmul.f32 -0.5, %v2410_v10  ;;  %v1419_v17 = vand.u32 2147483647, %v2410_v10 }
 0x342   :  { %2411 = vlog2.f32 %v1404_v46  ;;  %v1408_v14 = vadd.f32 1.0, %v1407_v13  ;;  %vm1411_vm2 = vcmp.lt.f32.partialorder %v1410_v23, 0.0004427343  ;;  %v1692_v13 = vld [vmem:[#allocation5 + $0xce8] sm:$0xff]  ;;  %v1691_v23 = vld [vmem:[#allocation5 + $0xce0] sm:$0xff] }
 0x343   :  { %2413 = vlog2.f32 %v1413_v19  ;;  %v1417_v15 = vadd.f32 1.0, %v1416_v20  ;;  %vm1420_vm3 = vcmp.lt.f32.partialorder %v1419_v17, 0.0004427343  ;;  %v1689_v19 = vld [vmem:[#allocation5 + $0xcd0] sm:$0xff]  ;;  %v1694_v20 = vld [vmem:[#allocation5 + $0xcf8] sm:$0xff] }
 0x344   :  { %v1409_v21 = vmul.f32 %v2408_v53, %v1408_v14  ;;  %v1690_v53 = vld [vmem:[#allocation5 + $0xcd8] sm:$0xff]  ;;  %v1693_v17 = vld [vmem:[#allocation5 + $0xcf0] sm:$0xff] }
 0x345   :  { %v1418_v11 = vmul.f32 %v2410_v10, %v1417_v15  ;;  %v1687_v10 = vld [vmem:[#allocation5 + $0xcc0] sm:$0xff]  ;;  %v2329_v46 = vpack.c.bf16 %v1690_v53, %v1688_v9  ;;  %v2333_v15 = vpack.c.bf16 %v1694_v20, %v1692_v13  ;;  %v2367_v9 = vpack.c.bf16 %v1725_v6, %v1723_v8 }
 0x346   :  { %v2331_v14 = vpack.c.bf16 %v1689_v19, %v1687_v10  ;;  %v2755_v53 = vld [vmem:[#allocation8] sm:$0xff]  ;;  %v1630_v6 = vrot.slane %v2430_v1, %v1625_v59 }
 0x347   :  { %2330 = vmatprep.subr.bf16.mxu1 %v2329_v46  ;;  %v1491_v10 = vrot.slane %v2755_v53, %v2747_v52  ;;  %v2759_v46 = vld [vmem:[#allocation8 + $0x8] sm:$0xff] }
 0x348   :  { %2332 = vmatpush1.bf16.msra.mxu1 %v2331_v14  ;;  %v1495_v19 = vrot.slane %v2759_v46, %v2747_v52 }
 0x349   :  { %2334 = vmatprep.subr.bf16.mxu1 %v2333_v15 }
 0x34c   :  { %v2412_v18 = vpop.eup %2411 }
 0x34d   :  { %v2414_v16 = vpop.eup %2413  ;;  %v1406_v31 = vmul.f32 0.6931472, %v2412_v18  ;;  %v1696_v18 = vld [vmem:[#allocation5 + $0xd08] sm:$0xff] }
 0x34e   :  { %v1415_v22 = vmul.f32 0.6931472, %v2414_v16  ;;  %v1698_v16 = vld [vmem:[#allocation5 + $0xd18] sm:$0xff] }
 0x34f   :  { %v1412_v32 = vsel %vm1411_vm2, %v1409_v21, %v1406_v31  ;;  %v2335_v31 = vpack.c.bf16 %v1693_v17, %v1691_v23  ;;  %v2337_v21 = vpack.c.bf16 %v1698_v16, %v1696_v18 }
 0x350   :  { %v1421_v33 = vsel %vm1420_vm3, %v1418_v11, %v1415_v22  ;;  %v1422_v26 = vadd.f32 %v1412_v32, %v1394_v34  ;;  %v1695_v22 = vld [vmem:[#allocation5 + $0xd00] sm:$0xff]  ;;  %v1697_v11 = vld [vmem:[#allocation5 + $0xd10] sm:$0xff]  ;;  %v1702_v32 = vld [vmem:[#allocation5 + $0xd38] sm:$0xff] }
 0x351   :  { %v1423_v24 = vadd.f32 %v1421_v33, %v1395_v12  ;;  %v1700_v12 = vld [vmem:[#allocation5 + $0xd28] sm:$0xff]  ;;  %2336 = vmatpush1.bf16.msra.mxu1 %v2335_v31  ;;  %v2339_v33 = vpack.c.bf16 %v1697_v11, %v1695_v22 }
 0x352   :  { %2338 = vmatprep.subr.bf16.mxu1 %v2337_v21  ;;  %v2341_v34 = vpack.c.bf16 %v1702_v32, %v1700_v12 }
 0x353   :  { %1560 = vmatprep.mubr.f32.mxu0 %v1423_v24  ;;  %v1699_v24 = vld [vmem:[#allocation5 + $0xd20] sm:$0xff] }
 0x354   :  { %1561 = vmatmul.mubr.f32.vlgmr.msra.gmra.mrb[8].mxu0 %v1422_v26  ;;  %v1701_v26 = vld [vmem:[#allocation5 + $0xd30] sm:$0xff] }
 0x355   :  { %2340 = vmatpush1.bf16.msra.mxu1 %v2339_v33  ;;  %v2343_v29 = vpack.c.bf16 %v1701_v26, %v1699_v24 }
 0x356   :  { %2342 = vmatprep.subr.bf16.mxu1 %v2341_v34 }
 0x359   :  { %2344 = vmatpush1.bf16.msra.mxu1 %v2343_v29 }
 0x35a   :  { %2346 = vmatprep.subr.bf16.mxu1 %v2345_v0 }
 0x35d   :  { %2348 = vmatpush1.bf16.msra.mxu1 %v2347_v41 }
 0x35e   :  { %2350 = vmatprep.subr.bf16.mxu1 %v2349_v42 }
 0x361   :  { %2352 = vmatpush1.bf16.msra.mxu1 %v2351_v47 }
 0x362   :  { %2354 = vmatprep.subr.bf16.mxu1 %v2353_v49 }
 0x365   :  { %2356 = vmatpush1.bf16.msra.mxu1 %v2355_v57 }
 0x366   :  { %2358 = vmatprep.subr.bf16.mxu1 %v2357_v58 }
 0x369   :  { %2360 = vmatpush1.bf16.msra.mxu1 %v2359_v38  ;;  %v1616_v38 = vrot.slane %v2429_v61, %v2710_v25 }
 0x36a   :  { %2362 = vmatprep.subr.bf16.mxu1 %v2361_v62 }
 0x36d   :  { %2364 = vmatpush1.bf16.msra.mxu1 %v2363_v7 }
 0x36e   :  { %2366 = vmatprep.subr.bf16.mxu1 %v2365_v51  ;;  %v1626_v51 = vrot.slane %v2429_v61, %v1625_v59 }
 0x371   :  { %2368 = vmatpush1.bf16.msra.mxu1 %v2367_v9 }
 0x427   :  { %v1562_v13 = vpop.f32.mrb[8].mxu0 }
 0x428   :  { %v1563_v20 = vadd.f32 %v1562_v13, %v1491_v10  ;;  %v1564_v14 = vpop.f32.mrb[9].mxu0 }
 0x429   :  { %v1565_v15 = vadd.f32 %v1564_v14, %v1495_v19 }
 0x42a   :  { %v1567_v23 = vmul.f32 %v1563_v20, %v2656_v2 }
 0x42b   :  { %v1568_v17 = vmul.f32 %v1565_v15, %v2658_v3 }
 0x42c   :  { %v1569_v18 = vrot.slane %v1567_v23, 4  ;;  %v1583_v16 = vmul.f32 %v1567_v23, %v1567_v23 }
 0x42d   :  { %v1575_v31 = vrot.slane %v1568_v17, 4  ;;  %v1584_v21 = vmul.f32 %v1568_v17, %v1568_v17 }
 0x42e   :  { %v1570_v22 = vadd.f32 %v1569_v18, %v1567_v23  ;;  %v1585_v11 = vrot.slane %v1583_v16, 4 }
 0x42f   :  { %v1576_v12 = vadd.f32 %v1575_v31, %v1568_v17  ;;  %v1591_v32 = vrot.slane %v1584_v21, 4 }
 0x430   :  { %v1571_v33 = vrot.slane %v1570_v22, 2  ;;  %v1586_v34 = vadd.f32 %v1585_v11, %v1583_v16 }
 0x431   :  { %v1577_v24 = vrot.slane %v1576_v12, 2  ;;  %v1592_v52 = vadd.f32 %v1591_v32, %v1584_v21 }
 0x432   :  { %v1572_v26 = vadd.f32 %v1571_v33, %v1570_v22  ;;  %v1587_v27 = vrot.slane %v1586_v34, 2 }
 0x433   :  { %v1578_v28 = vadd.f32 %v1577_v24, %v1576_v12  ;;  %v1593_v29 = vrot.slane %v1592_v52, 2 }
 0x434   :  { %v1573_v0 = vrot.slane %v1572_v26, 1  ;;  %v1588_v2 = vadd.f32 %v1587_v27, %v1586_v34 }
 0x435   :  { %v1579_v30 = vrot.slane %v1578_v28, 1  ;;  %v1594_v3 = vadd.f32 %v1593_v29, %v1592_v52 }
 0x436   :  { %v1574_v35 = vadd.f32 %v1573_v0, %v1572_v26  ;;  %v1589_v37 = vrot.slane %v1588_v2, 1 }
 0x437   :  { %v1580_v39 = vadd.f32 %v1579_v30, %v1578_v28  ;;  %v1595_v41 = vrot.slane %v1594_v3, 1 }
 0x438   :  { %v1581_v42 = vmul.f32 0.125, %v1574_v35  ;;  %v1590_v43 = vadd.f32 %v1589_v37, %v1588_v2  ;;  %v1730_v37 = vrot.slane %v2755_v53, %v1625_v59 }
 0x439   :  { %v1582_v48 = vmul.f32 0.125, %v1580_v39  ;;  %v1596_v44 = vadd.f32 %v1595_v41, %v1594_v3  ;;  %v1734_v39 = vrot.slane %v2759_v46, %v1625_v59 }
 0x43a   :  { %v1597_v45 = vmul.f32 0.125, %v1590_v43  ;;  %v1599_v47 = vmul.f32 %v1581_v42, %v1581_v42  ;;  %v1605_v60 = vsub.f32 %v1567_v23, %v1581_v42 }
 0x43b   :  { %v1598_v49 = vmul.f32 0.125, %v1596_v44  ;;  %v1600_v50 = vmul.f32 %v1582_v48, %v1582_v48  ;;  %v1606_v63 = vsub.f32 %v1568_v17, %v1582_v48 }
 0x43c   :  { %v1601_v54 = vsub.f32 %v1597_v45, %v1599_v47 }
 0x43d   :  { %v1602_v55 = vsub.f32 %v1598_v49, %v1600_v50 }
 0x43e   :  { %v1603_v56 = vmax.f32 %v1601_v54, 0.0 }
 0x43f   :  { %v1604_v57 = vmax.f32 %v1602_v55, 0.0 }
 0x440   :  { %v1607_v58 = vadd.f32 1e-05, %v1603_v56 }
 0x441   :  { %v1608_v36 = vadd.f32 1e-05, %v1604_v57 }
 0x442   :  { %2415 = vrsqrt.f32 %v1607_v58 }
 0x443   :  { %2417 = vrsqrt.f32 %v1608_v36 }
 0x44c   :  { %v2416_v62 = vpop.eup %2415 }
 0x44d   :  { %v2418_v5 = vpop.eup %2417  ;;  %v1611_v7 = vmul.f32 %v2416_v62, %v1605_v60 }
 0x44e   :  { %v1612_v8 = vmul.f32 %v2418_v5, %v1606_v63 }
 0x44f   :  { %v1621_v9 = vmul.f32 %v1616_v38, %v1611_v7 }
 0x450   :  { %v1622_v10 = vmul.f32 %v1620_v4, %v1612_v8 }
 0x451   :  { %v1631_v19 = vadd.f32 %v1626_v51, %v1621_v9 }
 0x452   :  { %v1632_v13 = vadd.f32 %v1630_v6, %v1622_v10 }
 0x453   :  { %v1635_v20 = vand.u32 2147483647, %v1631_v19  ;;  %v1633_v30 = vmax.f32 %v1631_v19, 0.0 }
 0x454   :  { %v1636_v40 = vand.u32 2147483647, %v1632_v13  ;;  %v1634_v29 = vmax.f32 %v1632_v13, 0.0 }
 0x455   :  { %v1637_v14 = vsub.f32 0.0, %v1635_v20 }
 0x456   :  { %v1638_v15 = vsub.f32 0.0, %v1636_v40 }
 0x457   :  { %v1639_v23 = vmul.f32 1.442695, %v1637_v14 }
 0x458   :  { %v1641_v18 = vmul.f32 1.442695, %v1638_v15 }
 0x459   :  { %2419 = vpow2.f32 %v1639_v23 }
 0x45a   :  { %2421 = vpow2.f32 %v1641_v18 }
 0x463   :  { %v2420_v17 = vpop.eup %2419 }
 0x464   :  { %v2422_v16 = vpop.eup %2421  ;;  %v1643_v25 = vadd.f32 1.0, %v2420_v17  ;;  %v1646_v21 = vmul.f32 -0.5, %v2420_v17  ;;  %v1649_v32 = vand.u32 2147483647, %v2420_v17 }
 0x465   :  { %v1652_v31 = vadd.f32 1.0, %v2422_v16  ;;  %v1655_v22 = vmul.f32 -0.5, %v2422_v16  ;;  %v1658_v33 = vand.u32 2147483647, %v2422_v16 }
 0x466   :  { %2423 = vlog2.f32 %v1643_v25  ;;  %v1647_v11 = vadd.f32 1.0, %v1646_v21  ;;  %vm1650_vm4 = vcmp.lt.f32.partialorder %v1649_v32, 0.0004427343 }
 0x467   :  { %2425 = vlog2.f32 %v1652_v31  ;;  %v1656_v12 = vadd.f32 1.0, %v1655_v22  ;;  %vm1659_vm5 = vcmp.lt.f32.partialorder %v1658_v33, 0.0004427343 }
 0x468   :  { %v1648_v26 = vmul.f32 %v2420_v17, %v1647_v11 }
 0x469   :  { %v1657_v28 = vmul.f32 %v2422_v16, %v1656_v12 }
 0x470   :  { %v2424_v34 = vpop.eup %2423 }
 0x471   :  { %v2426_v24 = vpop.eup %2425  ;;  %v1645_v52 = vmul.f32 0.6931472, %v2424_v34 }
 0x472   :  { %v1654_v27 = vmul.f32 0.6931472, %v2426_v24 }
 0x473   :  { %v1651_v0 = vsel %vm1650_vm4, %v1648_v26, %v1645_v52 }
 0x474   :  { %v1660_v2 = vsel %vm1659_vm5, %v1657_v28, %v1654_v27  ;;  %v1661_v35 = vadd.f32 %v1651_v0, %v1633_v30 }
 0x475   :  { %v1662_v3 = vadd.f32 %v1660_v2, %v1634_v29 }
 0x477   :  { %1799 = vmatprep.mubr.f32.mxu1 %v1662_v3 }
 0x478   :  { %1800 = vmatmul.mubr.f32.vlgmr.msra.gmra.mrb[4].mxu1 %v1661_v35 }
 0x54b   :  { %v1801_v41 = vpop.f32.mrb[4].mxu1 }
 0x54c   :  { %v1802_v42 = vadd.f32 %v1801_v41, %v1730_v37  ;;  %v1803_v43 = vpop.f32.mrb[5].mxu1 }
 0x54d   :  { %v1804_v48 = vadd.f32 %v1803_v43, %v1734_v39 }
 0x54e   :  { %1806 = vst [vmem:[#allocation10] sm:$0xff] %v1802_v42 }
 0x54f   :  { %1807 = vst [vmem:[#allocation10 + $0x8] sm:$0xff] %v1804_v48 }
 0x550   :  { %2530 = shalt.err (!%p2527_p8)
}
 0x551   :  { %s2531_s15 = scalar_lea.hbm %s2786_s4, 256 }
 0x552   :  { %p2532_p9 = scmp.ne.s32.totalorder %s2786_s4, %s2531_s15  ;;  %p2535_p10 = scmp.lt.u32.totalorder %s2531_s15, %s2786_s4 }
 0x554   :  { %p2537_p11 = pnand %p2535_p10, %p2532_p9 }
 0x556   :  { %2540 = shalt.err (!%p2537_p11)
}
 0x557   :  { %1817 = dma.vmem_to_hbm [thread:$0]  %s1815_s25, 256, %s2786_s4, [#allocation4]  }
 0x558   :  { %2547 = dma.done.wait [#allocation4], 256  }
 0x559   :  { %2548 = vsyncadd [#allocation4], 4294967040 }
 0x55a   :  { %1821 = vsyncpa [#allocation3], 1 }
 0x55b   :  { %1822 = vsyncpa [#allocation6], 1 }
 0x55c   :  { %1823 = vsyncpa [#allocation9], 1 }
 0x55d   :  { %1824 = vsyncpa [#allocation4], 1 }

</bundles_post_ra>
